<compile_context>
chip_gen: v7x
topology: tpu7x:2x2x1
jax: 0.10.0
libtpu: 0.0.40
codegen_flags: <defaults>
</compile_context>

<pallas_src>
import functools
import math

import jax
import jax.numpy as jnp
from jax.experimental import pallas as pl
from jax.experimental.pallas import tpu as pltpu

# ---------------------------------------------------------------------------
# Mini-BERT config standing in for AutoModel.from_pretrained(model_name)
# ---------------------------------------------------------------------------
VOCAB = 100
TYPE_VOCAB = 2
MAX_POS = 16
HIDDEN = 32
N_LAYERS = 2
N_HEADS = 4
HEAD_DIM = HIDDEN // N_HEADS
INTERMEDIATE = 64
NUM_CLASSES = 6
LANE_PAD = 128          # classifier output padded to a full 128-lane tile
LN_EPS = 1e-12
EMB_ROWS = VOCAB + MAX_POS + TYPE_VOCAB   # fused word|pos|type embedding table


# ---------------------------------------------------------------------------
# In-kernel helpers (operate on VMEM-resident values)
# ---------------------------------------------------------------------------
def _layernorm(y, g, b):
    mean = jnp.mean(y, axis=-1, keepdims=True)
    var = jnp.mean((y - mean) * (y - mean), axis=-1, keepdims=True)
    return (y - mean) * jax.lax.rsqrt(var + LN_EPS) * g + b


def _gelu(y):
    # TODO(synk): HF BERT uses exact erf-GELU; tanh approximation used here.
    c = math.sqrt(2.0 / math.pi)
    return 0.5 * y * (1.0 + jnp.tanh(c * (y + 0.044715 * y * y * y)))


# ---------------------------------------------------------------------------
# One fused kernel for the whole model (activations never leave VMEM)
# ---------------------------------------------------------------------------
def _fused_model_kernel(ids_ref, am_ref, emb_ref, gvec_ref,
                        wqkv_ref, wof_ref, w2_ref, lvec_ref, headw_ref,
                        logits_ref, *, batch, seq):
    H, D, NH, I = HIDDEN, HEAD_DIM, N_HEADS, INTERMEDIATE
    M = batch * seq
    scale = 1.0 / math.sqrt(D)

    # ---- fused embedding lookup: word + position + type in ONE matmul -------
    ids = ids_ref[...]                                  # [M, 3] int32
    word_ids = ids[:, 0:1]
    type_ids = ids[:, 1:2]
    pos_ids = ids[:, 2:3]
    col = jax.lax.broadcasted_iota(jnp.int32, (M, EMB_ROWS), 1)
    onehot = ((col == word_ids).astype(jnp.float32)
              + (col == pos_ids + VOCAB).astype(jnp.float32)
              + (col == type_ids + (VOCAB + MAX_POS)).astype(jnp.float32))
    emb = jnp.dot(onehot, emb_ref[...], preferred_element_type=jnp.float32)  # [M,H]

    gv = gvec_ref[...]                                  # [8, 128] packed globals
    x = _layernorm(emb, gv[0:1, :H], gv[1:2, :H])

    # ---- additive attention mask, built & broadcast ONCE for all layers -----
    att = am_ref[...].astype(jnp.float32)               # [B, S]
    ext = (1.0 - att) * -10000.0                        # [B, S]
    ext3 = jnp.broadcast_to(ext[:, None, :], (batch, seq, seq))   # [B, S, S]
    mask_all = jnp.concatenate([ext3] * NH, axis=0)     # [(NH*B), S, S], order (h, b)

    for l in range(N_LAYERS):
        lv = lvec_ref[l]                                # [8, 128] per-layer vectors
        wof_l = wof_ref[l]                              # [H, H+I] = wo | w1

        # ---- fused QKV projection: single [M,H] @ [H,3H] matmul -------------
        qkv = (jnp.dot(x, wqkv_ref[l], preferred_element_type=jnp.float32)
               + lv[0:1, :3 * H])                       # [M, 3H]

        # ---- batched-heads attention: heads stacked into the batch dim ------
        q_all = jnp.concatenate(
            [qkv[:, h * D:(h + 1) * D].reshape(batch, seq, D)
             for h in range(NH)], axis=0)               # [(NH*B), S, D]
        k_all = jnp.concatenate(
            [qkv[:, H + h * D:H + (h + 1) * D].reshape(batch, seq, D)
             for h in range(NH)], axis=0)
        v_all = jnp.concatenate(
            [qkv[:, 2 * H + h * D:2 * H + (h + 1) * D].reshape(batch, seq, D)
             for h in range(NH)], axis=0)

        s = (jnp.einsum("bqd,bkd->bqk", q_all, k_all,
                        preferred_element_type=jnp.float32) * scale + mask_all)
        m = jnp.max(s, axis=-1, keepdims=True)
        p = jnp.exp(s - m)
        p = p / jnp.sum(p, axis=-1, keepdims=True)      # exact softmax
        ctx_all = jnp.einsum("bqk,bkd->bqd", p, v_all,
                             preferred_element_type=jnp.float32)  # [(NH*B), S, D]

        ctx = jnp.concatenate(
            [ctx_all[h * batch:(h + 1) * batch].reshape(M, D) for h in range(NH)],
            axis=-1)                                    # [M, H]

        # ---- output projection + residual + LayerNorm ------------------------
        attn_out = (jnp.dot(ctx, wof_l[:, :H], preferred_element_type=jnp.float32)
                    + lv[1:2, :H])
        x = _layernorm(attn_out + x, lv[2:3, :H], lv[3:4, :H])

        # ---- feed-forward (GELU) + residual + LayerNorm -----------------------
        h1 = _gelu(jnp.dot(x, wof_l[:, H:H + I], preferred_element_type=jnp.float32)
                   + lv[4:5, :I])
        ff = (jnp.dot(h1, w2_ref[l], preferred_element_type=jnp.float32)
              + lv[5:6, :H])
        x = _layernorm(ff + x, lv[6:7, :H], lv[7:8, :H])

    # ---- BERT pooler on the CLS row of each example ---------------------------
    cls = x.reshape(batch, seq, H)[:, 0, :]             # [B, H]
    hw = headw_ref[...]                                 # [H, H+128] = pool_w | cls_w
    pooled = jnp.tanh(jnp.dot(cls, hw[:, :H], preferred_element_type=jnp.float32)
                      + gv[2:3, :H])
    # Dropout(0.3): identity in eval/inference mode (deterministic forward).
    logits = (jnp.dot(pooled, hw[:, H:], preferred_element_type=jnp.float32)
              + gv[3:4, :])
    logits_ref[...] = logits.astype(logits_ref.dtype)   # [B, 128] lane-dense store


# ---------------------------------------------------------------------------
# Parameters (deterministic synthetic init — no checkpoint loading)
# ---------------------------------------------------------------------------
def init_params(key):
    keys = iter(jax.random.split(key, 64))

    def dense(shape):
        return jax.random.normal(next(keys), shape, jnp.float32) * 0.02

    p = {
        "word_emb": dense((VOCAB, HIDDEN)),
        "pos_emb": dense((MAX_POS, HIDDEN)),
        "type_emb": dense((TYPE_VOCAB, HIDDEN)),
        "emb_ln_g": jnp.ones((HIDDEN,), jnp.float32),
        "emb_ln_b": jnp.zeros((HIDDEN,), jnp.float32),
        "layers": [],
        "pool_w": dense((HIDDEN, HIDDEN)),
        "pool_b": jnp.zeros((HIDDEN,), jnp.float32),
        "cls_w": dense((HIDDEN, NUM_CLASSES)),
        "cls_b": jnp.zeros((NUM_CLASSES,), jnp.float32),
    }
    for _ in range(N_LAYERS):
        p["layers"].append({
            "wq": dense((HIDDEN, HIDDEN)), "bq": jnp.zeros((HIDDEN,), jnp.float32),
            "wk": dense((HIDDEN, HIDDEN)), "bk": jnp.zeros((HIDDEN,), jnp.float32),
            "wv": dense((HIDDEN, HIDDEN)), "bv": jnp.zeros((HIDDEN,), jnp.float32),
            "wo": dense((HIDDEN, HIDDEN)), "bo": jnp.zeros((HIDDEN,), jnp.float32),
            "ln1_g": jnp.ones((HIDDEN,), jnp.float32),
            "ln1_b": jnp.zeros((HIDDEN,), jnp.float32),
            "w1": dense((HIDDEN, INTERMEDIATE)),
            "b1": jnp.zeros((INTERMEDIATE,), jnp.float32),
            "w2": dense((INTERMEDIATE, HIDDEN)),
            "b2": jnp.zeros((HIDDEN,), jnp.float32),
            "ln2_g": jnp.ones((HIDDEN,), jnp.float32),
            "ln2_b": jnp.zeros((HIDDEN,), jnp.float32),
        })
    return p


def pack_params(p):
    """Fuse weights into 7 dense operands (embedding table, packed vectors,
    stacked/fused matrices) so the kernel prologue issues few, larger DMAs."""
    layers = p["layers"]

    # word | pos | type embedding rows stacked into one table.
    emb_table = jnp.concatenate([p["word_emb"], p["pos_emb"], p["type_emb"]], axis=0)

    # Global small vectors packed into one [8, 128] array.
    gvec = jnp.zeros((8, LANE_PAD), jnp.float32)
    gvec = gvec.at[0, :HIDDEN].set(p["emb_ln_g"])
    gvec = gvec.at[1, :HIDDEN].set(p["emb_ln_b"])
    gvec = gvec.at[2, :HIDDEN].set(p["pool_b"])
    gvec = gvec.at[3, :NUM_CLASSES].set(p["cls_b"])

    # All per-layer biases / LayerNorm params packed into one [L, 8, 128] array.
    lvec = jnp.zeros((N_LAYERS, 8, LANE_PAD), jnp.float32)
    for l, lp in enumerate(layers):
        lvec = lvec.at[l, 0, :3 * HIDDEN].set(
            jnp.concatenate([lp["bq"], lp["bk"], lp["bv"]]))
        lvec = lvec.at[l, 1, :HIDDEN].set(lp["bo"])
        lvec = lvec.at[l, 2, :HIDDEN].set(lp["ln1_g"])
        lvec = lvec.at[l, 3, :HIDDEN].set(lp["ln1_b"])
        lvec = lvec.at[l, 4, :INTERMEDIATE].set(lp["b1"])
        lvec = lvec.at[l, 5, :HIDDEN].set(lp["b2"])
        lvec = lvec.at[l, 6, :HIDDEN].set(lp["ln2_g"])
        lvec = lvec.at[l, 7, :HIDDEN].set(lp["ln2_b"])

    wqkv = jnp.stack([jnp.concatenate([lp["wq"], lp["wk"], lp["wv"]], axis=1)
                      for lp in layers])                          # [L, H, 3H]
    wof = jnp.stack([jnp.concatenate([lp["wo"], lp["w1"]], axis=1)
                     for lp in layers])                           # [L, H, H+I]
    w2 = jnp.stack([lp["w2"] for lp in layers])                   # [L, I, H]

    cls_w_pad = (jnp.zeros((HIDDEN, LANE_PAD), jnp.float32)
                 .at[:, :NUM_CLASSES].set(p["cls_w"]))
    head_w = jnp.concatenate([p["pool_w"], cls_w_pad], axis=1)    # [H, H+128]

    return {"emb_table": emb_table, "gvec": gvec, "lvec": lvec,
            "wqkv": wqkv, "wof": wof, "w2": w2, "head_w": head_w}


# ---------------------------------------------------------------------------
# Forward pass (mirrors SentimentClassifier_en.forward) — one pallas_call
# ---------------------------------------------------------------------------
def sentiment_classifier_forward(packed, input_ids, attention_mask, token_type_ids):
    B, S = input_ids.shape
    M = B * S

    # Word/type/position ids packed into one tiny int operand; positions are a
    # compile-time constant under jit, so the wrapper does no real compute.
    pos = jnp.tile(jnp.arange(S, dtype=jnp.int32), B).reshape(M, 1)
    ids = jnp.concatenate([input_ids.reshape(M, 1).astype(jnp.int32),
                           token_type_ids.reshape(M, 1).astype(jnp.int32),
                           pos], axis=1)                           # [M, 3]
    am = attention_mask.astype(jnp.int32)                          # [B, S]

    operands = (ids, am, packed["emb_table"], packed["gvec"],
                packed["wqkv"], packed["wof"], packed["w2"],
                packed["lvec"], packed["head_w"])

    # Whole model is ~100 KiB, so: single gridless invocation, whole-array VMEM
    # blocks, lane-padded (128-wide) output for dense stores.
    # TODO(synk): for non-trivial batch on v7x add a "parallel" batch grid axis
    # (2 TensorCores) and cast matmul inputs to bf16 on v6e/v7x; at these tiny
    # shapes both are a wash, and larger configs would also need BlockSpec
    # pipelining + an explicit vmem_limit_bytes.
    logits_pad = pl.pallas_call(
        functools.partial(_fused_model_kernel, batch=B, seq=S),
        out_shape=jax.ShapeDtypeStruct((B, LANE_PAD), jnp.float32),
        in_specs=[pl.BlockSpec(memory_space=pltpu.MemorySpace.VMEM)
                  for _ in operands],
        out_specs=pl.BlockSpec(memory_space=pltpu.MemorySpace.VMEM),
    )(*operands)

    # Lane-padded logits; columns [:NUM_CLASSES] are the classifier outputs.
    return logits_pad


# ---------------------------------------------------------------------------
if __name__ == "__main__":
    root = jax.random.PRNGKey(0)
    pkey, ikey = jax.random.split(root)
    params = init_params(pkey)
    packed = pack_params(params)

    B, S = 2, 8
    input_ids = jax.random.randint(ikey, (B, S), 0, VOCAB, dtype=jnp.int32)
    attention_mask = jnp.ones((B, S), jnp.int32).at[1, 6:].set(0)   # pad tail of ex. 1
    token_type_ids = jnp.zeros((B, S), jnp.int32)

    forward = jax.jit(sentiment_classifier_forward)
    logits_pad = forward(packed, input_ids, attention_mask, token_type_ids)
    jax.block_until_ready(logits_pad)

    logits = logits_pad[:, :NUM_CLASSES]                            # [B, 6]
    assert logits_pad.shape == (B, LANE_PAD)
    assert logits.shape == (B, NUM_CLASSES)
    assert bool(jnp.all(jnp.isfinite(logits)))
    print("KERNEL_OK")
</pallas_src>

<mosaic_0001>
module attributes {stable_mosaic.version = 11 : i64} {
  func.func @_fused_model_kernel(%arg0: memref<16x3xi32, #tpu.memory_space<vmem>>, %arg1: memref<2x8xi32, #tpu.memory_space<vmem>>, %arg2: memref<118x32xf32, #tpu.memory_space<vmem>>, %arg3: memref<8x128xf32, #tpu.memory_space<vmem>>, %arg4: memref<2x32x96xf32, #tpu.memory_space<vmem>>, %arg5: memref<2x32x96xf32, #tpu.memory_space<vmem>>, %arg6: memref<2x64x32xf32, #tpu.memory_space<vmem>>, %arg7: memref<2x8x128xf32, #tpu.memory_space<vmem>>, %arg8: memref<32x160xf32, #tpu.memory_space<vmem>>, %arg9: memref<2x128xf32, #tpu.memory_space<vmem>>) attributes {dimension_semantics = [], scalar_prefetch = 0 : i64, scratch_operands = 0 : i64, tpu.core_type = #tpu.core_type<tc>} {
    %c0 = arith.constant 0 : index
    %c0_0 = arith.constant 0 : index
    %0 = vector.load %arg0[%c0, %c0_0] : memref<16x3xi32, #tpu.memory_space<vmem>>, vector<16x3xi32>
    %1 = vector.extract_strided_slice %0 {offsets = [0, 0], sizes = [16, 1], strides = [1, 1]} : vector<16x3xi32> to vector<16x1xi32>
    %2 = vector.extract_strided_slice %0 {offsets = [0, 1], sizes = [16, 1], strides = [1, 1]} : vector<16x3xi32> to vector<16x1xi32>
    %3 = vector.extract_strided_slice %0 {offsets = [0, 2], sizes = [16, 1], strides = [1, 1]} : vector<16x3xi32> to vector<16x1xi32>
    %4 = tpu.iota {dimensions = array<i32: 1>} : vector<16x118xi32>
    %5 = vector.broadcast %1 : vector<16x1xi32> to vector<16x118xi32>
    %6 = arith.cmpi eq, %4, %5 : vector<16x118xi32>
    %7 = arith.extui %6 : vector<16x118xi1> to vector<16x118xi32>
    %8 = arith.sitofp %7 : vector<16x118xi32> to vector<16x118xf32>
    %c100_i32 = arith.constant 100 : i32
    %9 = vector.broadcast %c100_i32 : i32 to vector<16x1xi32>
    %10 = arith.addi %3, %9 : vector<16x1xi32>
    %11 = vector.broadcast %10 : vector<16x1xi32> to vector<16x118xi32>
    %12 = arith.cmpi eq, %4, %11 : vector<16x118xi32>
    %13 = arith.extui %12 : vector<16x118xi1> to vector<16x118xi32>
    %14 = arith.sitofp %13 : vector<16x118xi32> to vector<16x118xf32>
    %15 = arith.addf %8, %14 : vector<16x118xf32>
    %c116_i32 = arith.constant 116 : i32
    %16 = vector.broadcast %c116_i32 : i32 to vector<16x1xi32>
    %17 = arith.addi %2, %16 : vector<16x1xi32>
    %18 = vector.broadcast %17 : vector<16x1xi32> to vector<16x118xi32>
    %19 = arith.cmpi eq, %4, %18 : vector<16x118xi32>
    %20 = arith.extui %19 : vector<16x118xi1> to vector<16x118xi32>
    %21 = arith.sitofp %20 : vector<16x118xi32> to vector<16x118xf32>
    %22 = arith.addf %15, %21 : vector<16x118xf32>
    %c0_1 = arith.constant 0 : index
    %c0_2 = arith.constant 0 : index
    %23 = vector.load %arg2[%c0_1, %c0_2] : memref<118x32xf32, #tpu.memory_space<vmem>>, vector<118x32xf32>
    %cst = arith.constant dense<0.000000e+00> : vector<16x32xf32>
    %24 = tpu.matmul %22, %23, %cst {dimension_numbers = #tpu.dot_dimension_numbers<[1], [0], [0], [1], [0, 0, 1, 1], [], []>} : vector<16x118xf32>, vector<118x32xf32>, vector<16x32xf32> -> vector<16x32xf32>
    %c0_3 = arith.constant 0 : index
    %c0_4 = arith.constant 0 : index
    %25 = vector.load %arg3[%c0_3, %c0_4] : memref<8x128xf32, #tpu.memory_space<vmem>>, vector<8x128xf32>
    %26 = vector.extract_strided_slice %25 {offsets = [0, 0], sizes = [1, 32], strides = [1, 1]} : vector<8x128xf32> to vector<1x32xf32>
    %27 = vector.extract_strided_slice %25 {offsets = [1, 0], sizes = [1, 32], strides = [1, 1]} : vector<8x128xf32> to vector<1x32xf32>
    %cst_5 = arith.constant dense<0.000000e+00> : vector<16xf32>
    %28 = vector.multi_reduction <add>, %24, %cst_5 [1] : vector<16x32xf32> to vector<16xf32>
    %29 = vector.shape_cast %28 : vector<16xf32> to vector<16x1xf32>
    %cst_6 = arith.constant 3.200000e+01 : f32
    %30 = vector.broadcast %cst_6 : f32 to vector<16x1xf32>
    %31 = arith.divf %29, %30 : vector<16x1xf32>
    %32 = vector.broadcast %31 : vector<16x1xf32> to vector<16x32xf32>
    %33 = arith.subf %24, %32 : vector<16x32xf32>
    %34 = vector.broadcast %31 : vector<16x1xf32> to vector<16x32xf32>
    %35 = arith.subf %24, %34 : vector<16x32xf32>
    %36 = arith.mulf %33, %35 : vector<16x32xf32>
    %cst_7 = arith.constant dense<0.000000e+00> : vector<16xf32>
    %37 = vector.multi_reduction <add>, %36, %cst_7 [1] : vector<16x32xf32> to vector<16xf32>
    %38 = vector.shape_cast %37 : vector<16xf32> to vector<16x1xf32>
    %cst_8 = arith.constant 3.200000e+01 : f32
    %39 = vector.broadcast %cst_8 : f32 to vector<16x1xf32>
    %40 = arith.divf %38, %39 : vector<16x1xf32>
    %41 = vector.broadcast %31 : vector<16x1xf32> to vector<16x32xf32>
    %42 = arith.subf %24, %41 : vector<16x32xf32>
    %cst_9 = arith.constant 9.99999996E-13 : f32
    %43 = vector.broadcast %cst_9 : f32 to vector<16x1xf32>
    %44 = arith.addf %40, %43 : vector<16x1xf32>
    %45 = math.rsqrt %44 : vector<16x1xf32>
    %46 = vector.broadcast %45 : vector<16x1xf32> to vector<16x32xf32>
    %47 = arith.mulf %42, %46 : vector<16x32xf32>
    %48 = vector.broadcast %26 : vector<1x32xf32> to vector<16x32xf32>
    %49 = arith.mulf %47, %48 : vector<16x32xf32>
    %50 = vector.broadcast %27 : vector<1x32xf32> to vector<16x32xf32>
    %51 = arith.addf %49, %50 : vector<16x32xf32>
    %c0_10 = arith.constant 0 : index
    %c0_11 = arith.constant 0 : index
    %52 = vector.load %arg1[%c0_10, %c0_11] : memref<2x8xi32, #tpu.memory_space<vmem>>, vector<2x8xi32>
    %53 = arith.sitofp %52 : vector<2x8xi32> to vector<2x8xf32>
    %cst_12 = arith.constant 1.000000e+00 : f32
    %54 = vector.broadcast %cst_12 : f32 to vector<2x8xf32>
    %55 = arith.subf %54, %53 : vector<2x8xf32>
    %cst_13 = arith.constant -1.000000e+04 : f32
    %56 = vector.broadcast %cst_13 : f32 to vector<2x8xf32>
    %57 = arith.mulf %55, %56 : vector<2x8xf32>
    %58 = vector.shape_cast %57 : vector<2x8xf32> to vector<2x1x8xf32>
    %59 = vector.shape_cast %58 : vector<2x1x8xf32> to vector<2x1x8xf32>
    %60 = vector.broadcast %59 : vector<2x1x8xf32> to vector<2x8x8xf32>
    %61 = tpu.concatenate %60, %60, %60, %60 in 0 : vector<2x8x8xf32>, vector<2x8x8xf32>, vector<2x8x8xf32>, vector<2x8x8xf32> -> vector<8x8x8xf32>
    %c0_14 = arith.constant 0 : index
    %c0_15 = arith.constant 0 : index
    %c0_16 = arith.constant 0 : index
    %62 = vector.load %arg7[%c0_14, %c0_15, %c0_16] : memref<2x8x128xf32, #tpu.memory_space<vmem>>, vector<1x8x128xf32>
    %63 = vector.shape_cast %62 : vector<1x8x128xf32> to vector<8x128xf32>
    %c0_17 = arith.constant 0 : index
    %c0_18 = arith.constant 0 : index
    %c0_19 = arith.constant 0 : index
    %64 = vector.load %arg5[%c0_17, %c0_18, %c0_19] : memref<2x32x96xf32, #tpu.memory_space<vmem>>, vector<1x32x96xf32>
    %65 = vector.shape_cast %64 : vector<1x32x96xf32> to vector<32x96xf32>
    %c0_20 = arith.constant 0 : index
    %c0_21 = arith.constant 0 : index
    %c0_22 = arith.constant 0 : index
    %66 = vector.load %arg4[%c0_20, %c0_21, %c0_22] : memref<2x32x96xf32, #tpu.memory_space<vmem>>, vector<1x32x96xf32>
    %67 = vector.shape_cast %66 : vector<1x32x96xf32> to vector<32x96xf32>
    %cst_23 = arith.constant dense<0.000000e+00> : vector<16x96xf32>
    %68 = tpu.matmul %51, %67, %cst_23 {dimension_numbers = #tpu.dot_dimension_numbers<[1], [0], [0], [1], [0, 0, 1, 1], [], []>} : vector<16x32xf32>, vector<32x96xf32>, vector<16x96xf32> -> vector<16x96xf32>
    %69 = vector.extract_strided_slice %63 {offsets = [0, 0], sizes = [1, 96], strides = [1, 1]} : vector<8x128xf32> to vector<1x96xf32>
    %70 = vector.broadcast %69 : vector<1x96xf32> to vector<16x96xf32>
    %71 = arith.addf %68, %70 : vector<16x96xf32>
    %72 = vector.extract_strided_slice %71 {offsets = [0, 0], sizes = [16, 8], strides = [1, 1]} : vector<16x96xf32> to vector<16x8xf32>
    %73 = vector.shape_cast %72 : vector<16x8xf32> to vector<2x8x8xf32>
    %74 = vector.extract_strided_slice %71 {offsets = [0, 8], sizes = [16, 8], strides = [1, 1]} : vector<16x96xf32> to vector<16x8xf32>
    %75 = vector.shape_cast %74 : vector<16x8xf32> to vector<2x8x8xf32>
    %76 = vector.extract_strided_slice %71 {offsets = [0, 16], sizes = [16, 8], strides = [1, 1]} : vector<16x96xf32> to vector<16x8xf32>
    %77 = vector.shape_cast %76 : vector<16x8xf32> to vector<2x8x8xf32>
    %78 = vector.extract_strided_slice %71 {offsets = [0, 24], sizes = [16, 8], strides = [1, 1]} : vector<16x96xf32> to vector<16x8xf32>
    %79 = vector.shape_cast %78 : vector<16x8xf32> to vector<2x8x8xf32>
    %80 = tpu.concatenate %73, %75, %77, %79 in 0 : vector<2x8x8xf32>, vector<2x8x8xf32>, vector<2x8x8xf32>, vector<2x8x8xf32> -> vector<8x8x8xf32>
    %81 = vector.extract_strided_slice %71 {offsets = [0, 32], sizes = [16, 8], strides = [1, 1]} : vector<16x96xf32> to vector<16x8xf32>
    %82 = vector.shape_cast %81 : vector<16x8xf32> to vector<2x8x8xf32>
    %83 = vector.extract_strided_slice %71 {offsets = [0, 40], sizes = [16, 8], strides = [1, 1]} : vector<16x96xf32> to vector<16x8xf32>
    %84 = vector.shape_cast %83 : vector<16x8xf32> to vector<2x8x8xf32>
    %85 = vector.extract_strided_slice %71 {offsets = [0, 48], sizes = [16, 8], strides = [1, 1]} : vector<16x96xf32> to vector<16x8xf32>
    %86 = vector.shape_cast %85 : vector<16x8xf32> to vector<2x8x8xf32>
    %87 = vector.extract_strided_slice %71 {offsets = [0, 56], sizes = [16, 8], strides = [1, 1]} : vector<16x96xf32> to vector<16x8xf32>
    %88 = vector.shape_cast %87 : vector<16x8xf32> to vector<2x8x8xf32>
    %89 = tpu.concatenate %82, %84, %86, %88 in 0 : vector<2x8x8xf32>, vector<2x8x8xf32>, vector<2x8x8xf32>, vector<2x8x8xf32> -> vector<8x8x8xf32>
    %90 = vector.extract_strided_slice %71 {offsets = [0, 64], sizes = [16, 8], strides = [1, 1]} : vector<16x96xf32> to vector<16x8xf32>
    %91 = vector.shape_cast %90 : vector<16x8xf32> to vector<2x8x8xf32>
    %92 = vector.extract_strided_slice %71 {offsets = [0, 72], sizes = [16, 8], strides = [1, 1]} : vector<16x96xf32> to vector<16x8xf32>
    %93 = vector.shape_cast %92 : vector<16x8xf32> to vector<2x8x8xf32>
    %94 = vector.extract_strided_slice %71 {offsets = [0, 80], sizes = [16, 8], strides = [1, 1]} : vector<16x96xf32> to vector<16x8xf32>
    %95 = vector.shape_cast %94 : vector<16x8xf32> to vector<2x8x8xf32>
    %96 = vector.extract_strided_slice %71 {offsets = [0, 88], sizes = [16, 8], strides = [1, 1]} : vector<16x96xf32> to vector<16x8xf32>
    %97 = vector.shape_cast %96 : vector<16x8xf32> to vector<2x8x8xf32>
    %98 = tpu.concatenate %91, %93, %95, %97 in 0 : vector<2x8x8xf32>, vector<2x8x8xf32>, vector<2x8x8xf32>, vector<2x8x8xf32> -> vector<8x8x8xf32>
    "tpu.trace_start"() <{level = 10 : i32, message = "bqd,bkd->bqk"}> : () -> ()
    %cst_24 = arith.constant dense<0.000000e+00> : vector<8x8x8xf32>
    %99 = tpu.matmul %80, %89, %cst_24 {dimension_numbers = #tpu.dot_dimension_numbers<[2], [2], [1], [1], [0, 0, 0, 1, 1, 1], [0], [0]>} : vector<8x8x8xf32>, vector<8x8x8xf32>, vector<8x8x8xf32> -> vector<8x8x8xf32>
    "tpu.trace_stop"() : () -> ()
    %cst_25 = arith.constant 0.353553385 : f32
    %100 = vector.broadcast %cst_25 : f32 to vector<8x8x8xf32>
    %101 = arith.mulf %99, %100 : vector<8x8x8xf32>
    %102 = arith.addf %101, %61 : vector<8x8x8xf32>
    %cst_26 = arith.constant dense<0xFF800000> : vector<8x8xf32>
    %103 = vector.multi_reduction <maximumf>, %102, %cst_26 [2] : vector<8x8x8xf32> to vector<8x8xf32>
    %104 = vector.shape_cast %103 : vector<8x8xf32> to vector<8x8x1xf32>
    %105 = vector.broadcast %104 : vector<8x8x1xf32> to vector<8x8x8xf32>
    %106 = arith.subf %102, %105 : vector<8x8x8xf32>
    %107 = math.exp %106 : vector<8x8x8xf32>
    %cst_27 = arith.constant dense<0.000000e+00> : vector<8x8xf32>
    %108 = vector.multi_reduction <add>, %107, %cst_27 [2] : vector<8x8x8xf32> to vector<8x8xf32>
    %109 = vector.shape_cast %108 : vector<8x8xf32> to vector<8x8x1xf32>
    %110 = vector.broadcast %109 : vector<8x8x1xf32> to vector<8x8x8xf32>
    %111 = arith.divf %107, %110 : vector<8x8x8xf32>
    "tpu.trace_start"() <{level = 10 : i32, message = "bqk,bkd->bqd"}> : () -> ()
    %cst_28 = arith.constant dense<0.000000e+00> : vector<8x8x8xf32>
    %112 = tpu.matmul %111, %98, %cst_28 {dimension_numbers = #tpu.dot_dimension_numbers<[2], [1], [1], [2], [0, 0, 0, 1, 1, 2], [0], [0]>} : vector<8x8x8xf32>, vector<8x8x8xf32>, vector<8x8x8xf32> -> vector<8x8x8xf32>
    "tpu.trace_stop"() : () -> ()
    %113 = vector.extract_strided_slice %112 {offsets = [0, 0, 0], sizes = [2, 8, 8], strides = [1, 1, 1]} : vector<8x8x8xf32> to vector<2x8x8xf32>
    %114 = vector.shape_cast %113 : vector<2x8x8xf32> to vector<16x8xf32>
    %115 = vector.extract_strided_slice %112 {offsets = [2, 0, 0], sizes = [2, 8, 8], strides = [1, 1, 1]} : vector<8x8x8xf32> to vector<2x8x8xf32>
    %116 = vector.shape_cast %115 : vector<2x8x8xf32> to vector<16x8xf32>
    %117 = vector.extract_strided_slice %112 {offsets = [4, 0, 0], sizes = [2, 8, 8], strides = [1, 1, 1]} : vector<8x8x8xf32> to vector<2x8x8xf32>
    %118 = vector.shape_cast %117 : vector<2x8x8xf32> to vector<16x8xf32>
    %119 = vector.extract_strided_slice %112 {offsets = [6, 0, 0], sizes = [2, 8, 8], strides = [1, 1, 1]} : vector<8x8x8xf32> to vector<2x8x8xf32>
    %120 = vector.shape_cast %119 : vector<2x8x8xf32> to vector<16x8xf32>
    %121 = tpu.concatenate %114, %116, %118, %120 in 1 : vector<16x8xf32>, vector<16x8xf32>, vector<16x8xf32>, vector<16x8xf32> -> vector<16x32xf32>
    %122 = vector.extract_strided_slice %65 {offsets = [0, 0], sizes = [32, 32], strides = [1, 1]} : vector<32x96xf32> to vector<32x32xf32>
    %cst_29 = arith.constant dense<0.000000e+00> : vector<16x32xf32>
    %123 = tpu.matmul %121, %122, %cst_29 {dimension_numbers = #tpu.dot_dimension_numbers<[1], [0], [0], [1], [0, 0, 1, 1], [], []>} : vector<16x32xf32>, vector<32x32xf32>, vector<16x32xf32> -> vector<16x32xf32>
    %124 = vector.extract_strided_slice %63 {offsets = [1, 0], sizes = [1, 32], strides = [1, 1]} : vector<8x128xf32> to vector<1x32xf32>
    %125 = vector.broadcast %124 : vector<1x32xf32> to vector<16x32xf32>
    %126 = arith.addf %123, %125 : vector<16x32xf32>
    %127 = arith.addf %126, %51 : vector<16x32xf32>
    %128 = vector.extract_strided_slice %63 {offsets = [2, 0], sizes = [1, 32], strides = [1, 1]} : vector<8x128xf32> to vector<1x32xf32>
    %129 = vector.extract_strided_slice %63 {offsets = [3, 0], sizes = [1, 32], strides = [1, 1]} : vector<8x128xf32> to vector<1x32xf32>
    %cst_30 = arith.constant dense<0.000000e+00> : vector<16xf32>
    %130 = vector.multi_reduction <add>, %127, %cst_30 [1] : vector<16x32xf32> to vector<16xf32>
    %131 = vector.shape_cast %130 : vector<16xf32> to vector<16x1xf32>
    %cst_31 = arith.constant 3.200000e+01 : f32
    %132 = vector.broadcast %cst_31 : f32 to vector<16x1xf32>
    %133 = arith.divf %131, %132 : vector<16x1xf32>
    %134 = vector.broadcast %133 : vector<16x1xf32> to vector<16x32xf32>
    %135 = arith.subf %127, %134 : vector<16x32xf32>
    %136 = vector.broadcast %133 : vector<16x1xf32> to vector<16x32xf32>
    %137 = arith.subf %127, %136 : vector<16x32xf32>
    %138 = arith.mulf %135, %137 : vector<16x32xf32>
    %cst_32 = arith.constant dense<0.000000e+00> : vector<16xf32>
    %139 = vector.multi_reduction <add>, %138, %cst_32 [1] : vector<16x32xf32> to vector<16xf32>
    %140 = vector.shape_cast %139 : vector<16xf32> to vector<16x1xf32>
    %cst_33 = arith.constant 3.200000e+01 : f32
    %141 = vector.broadcast %cst_33 : f32 to vector<16x1xf32>
    %142 = arith.divf %140, %141 : vector<16x1xf32>
    %143 = vector.broadcast %133 : vector<16x1xf32> to vector<16x32xf32>
    %144 = arith.subf %127, %143 : vector<16x32xf32>
    %cst_34 = arith.constant 9.99999996E-13 : f32
    %145 = vector.broadcast %cst_34 : f32 to vector<16x1xf32>
    %146 = arith.addf %142, %145 : vector<16x1xf32>
    %147 = math.rsqrt %146 : vector<16x1xf32>
    %148 = vector.broadcast %147 : vector<16x1xf32> to vector<16x32xf32>
    %149 = arith.mulf %144, %148 : vector<16x32xf32>
    %150 = vector.broadcast %128 : vector<1x32xf32> to vector<16x32xf32>
    %151 = arith.mulf %149, %150 : vector<16x32xf32>
    %152 = vector.broadcast %129 : vector<1x32xf32> to vector<16x32xf32>
    %153 = arith.addf %151, %152 : vector<16x32xf32>
    %154 = vector.extract_strided_slice %65 {offsets = [0, 32], sizes = [32, 64], strides = [1, 1]} : vector<32x96xf32> to vector<32x64xf32>
    %cst_35 = arith.constant dense<0.000000e+00> : vector<16x64xf32>
    %155 = tpu.matmul %153, %154, %cst_35 {dimension_numbers = #tpu.dot_dimension_numbers<[1], [0], [0], [1], [0, 0, 1, 1], [], []>} : vector<16x32xf32>, vector<32x64xf32>, vector<16x64xf32> -> vector<16x64xf32>
    %156 = vector.extract_strided_slice %63 {offsets = [4, 0], sizes = [1, 64], strides = [1, 1]} : vector<8x128xf32> to vector<1x64xf32>
    %157 = vector.broadcast %156 : vector<1x64xf32> to vector<16x64xf32>
    %158 = arith.addf %155, %157 : vector<16x64xf32>
    %cst_36 = arith.constant 5.000000e-01 : f32
    %159 = vector.broadcast %cst_36 : f32 to vector<16x64xf32>
    %160 = arith.mulf %159, %158 : vector<16x64xf32>
    %cst_37 = arith.constant 4.471500e-02 : f32
    %161 = vector.broadcast %cst_37 : f32 to vector<16x64xf32>
    %162 = arith.mulf %161, %158 : vector<16x64xf32>
    %163 = arith.mulf %162, %158 : vector<16x64xf32>
    %164 = arith.mulf %163, %158 : vector<16x64xf32>
    %165 = arith.addf %158, %164 : vector<16x64xf32>
    %cst_38 = arith.constant 0.797884583 : f32
    %166 = vector.broadcast %cst_38 : f32 to vector<16x64xf32>
    %167 = arith.mulf %166, %165 : vector<16x64xf32>
    %168 = math.tanh %167 : vector<16x64xf32>
    %cst_39 = arith.constant 1.000000e+00 : f32
    %169 = vector.broadcast %cst_39 : f32 to vector<16x64xf32>
    %170 = arith.addf %169, %168 : vector<16x64xf32>
    %171 = arith.mulf %160, %170 : vector<16x64xf32>
    %c0_40 = arith.constant 0 : index
    %c0_41 = arith.constant 0 : index
    %c0_42 = arith.constant 0 : index
    %172 = vector.load %arg6[%c0_40, %c0_41, %c0_42] : memref<2x64x32xf32, #tpu.memory_space<vmem>>, vector<1x64x32xf32>
    %173 = vector.shape_cast %172 : vector<1x64x32xf32> to vector<64x32xf32>
    %cst_43 = arith.constant dense<0.000000e+00> : vector<16x32xf32>
    %174 = tpu.matmul %171, %173, %cst_43 {dimension_numbers = #tpu.dot_dimension_numbers<[1], [0], [0], [1], [0, 0, 1, 1], [], []>} : vector<16x64xf32>, vector<64x32xf32>, vector<16x32xf32> -> vector<16x32xf32>
    %175 = vector.extract_strided_slice %63 {offsets = [5, 0], sizes = [1, 32], strides = [1, 1]} : vector<8x128xf32> to vector<1x32xf32>
    %176 = vector.broadcast %175 : vector<1x32xf32> to vector<16x32xf32>
    %177 = arith.addf %174, %176 : vector<16x32xf32>
    %178 = arith.addf %177, %153 : vector<16x32xf32>
    %179 = vector.extract_strided_slice %63 {offsets = [6, 0], sizes = [1, 32], strides = [1, 1]} : vector<8x128xf32> to vector<1x32xf32>
    %180 = vector.extract_strided_slice %63 {offsets = [7, 0], sizes = [1, 32], strides = [1, 1]} : vector<8x128xf32> to vector<1x32xf32>
    %cst_44 = arith.constant dense<0.000000e+00> : vector<16xf32>
    %181 = vector.multi_reduction <add>, %178, %cst_44 [1] : vector<16x32xf32> to vector<16xf32>
    %182 = vector.shape_cast %181 : vector<16xf32> to vector<16x1xf32>
    %cst_45 = arith.constant 3.200000e+01 : f32
    %183 = vector.broadcast %cst_45 : f32 to vector<16x1xf32>
    %184 = arith.divf %182, %183 : vector<16x1xf32>
    %185 = vector.broadcast %184 : vector<16x1xf32> to vector<16x32xf32>
    %186 = arith.subf %178, %185 : vector<16x32xf32>
    %187 = vector.broadcast %184 : vector<16x1xf32> to vector<16x32xf32>
    %188 = arith.subf %178, %187 : vector<16x32xf32>
    %189 = arith.mulf %186, %188 : vector<16x32xf32>
    %cst_46 = arith.constant dense<0.000000e+00> : vector<16xf32>
    %190 = vector.multi_reduction <add>, %189, %cst_46 [1] : vector<16x32xf32> to vector<16xf32>
    %191 = vector.shape_cast %190 : vector<16xf32> to vector<16x1xf32>
    %cst_47 = arith.constant 3.200000e+01 : f32
    %192 = vector.broadcast %cst_47 : f32 to vector<16x1xf32>
    %193 = arith.divf %191, %192 : vector<16x1xf32>
    %194 = vector.broadcast %184 : vector<16x1xf32> to vector<16x32xf32>
    %195 = arith.subf %178, %194 : vector<16x32xf32>
    %cst_48 = arith.constant 9.99999996E-13 : f32
    %196 = vector.broadcast %cst_48 : f32 to vector<16x1xf32>
    %197 = arith.addf %193, %196 : vector<16x1xf32>
    %198 = math.rsqrt %197 : vector<16x1xf32>
    %199 = vector.broadcast %198 : vector<16x1xf32> to vector<16x32xf32>
    %200 = arith.mulf %195, %199 : vector<16x32xf32>
    %201 = vector.broadcast %179 : vector<1x32xf32> to vector<16x32xf32>
    %202 = arith.mulf %200, %201 : vector<16x32xf32>
    %203 = vector.broadcast %180 : vector<1x32xf32> to vector<16x32xf32>
    %204 = arith.addf %202, %203 : vector<16x32xf32>
    %c1 = arith.constant 1 : index
    %c0_49 = arith.constant 0 : index
    %c0_50 = arith.constant 0 : index
    %205 = vector.load %arg7[%c1, %c0_49, %c0_50] : memref<2x8x128xf32, #tpu.memory_space<vmem>>, vector<1x8x128xf32>
    %206 = vector.shape_cast %205 : vector<1x8x128xf32> to vector<8x128xf32>
    %c1_51 = arith.constant 1 : index
    %c0_52 = arith.constant 0 : index
    %c0_53 = arith.constant 0 : index
    %207 = vector.load %arg5[%c1_51, %c0_52, %c0_53] : memref<2x32x96xf32, #tpu.memory_space<vmem>>, vector<1x32x96xf32>
    %208 = vector.shape_cast %207 : vector<1x32x96xf32> to vector<32x96xf32>
    %c1_54 = arith.constant 1 : index
    %c0_55 = arith.constant 0 : index
    %c0_56 = arith.constant 0 : index
    %209 = vector.load %arg4[%c1_54, %c0_55, %c0_56] : memref<2x32x96xf32, #tpu.memory_space<vmem>>, vector<1x32x96xf32>
    %210 = vector.shape_cast %209 : vector<1x32x96xf32> to vector<32x96xf32>
    %cst_57 = arith.constant dense<0.000000e+00> : vector<16x96xf32>
    %211 = tpu.matmul %204, %210, %cst_57 {dimension_numbers = #tpu.dot_dimension_numbers<[1], [0], [0], [1], [0, 0, 1, 1], [], []>} : vector<16x32xf32>, vector<32x96xf32>, vector<16x96xf32> -> vector<16x96xf32>
    %212 = vector.extract_strided_slice %206 {offsets = [0, 0], sizes = [1, 96], strides = [1, 1]} : vector<8x128xf32> to vector<1x96xf32>
    %213 = vector.broadcast %212 : vector<1x96xf32> to vector<16x96xf32>
    %214 = arith.addf %211, %213 : vector<16x96xf32>
    %215 = vector.extract_strided_slice %214 {offsets = [0, 0], sizes = [16, 8], strides = [1, 1]} : vector<16x96xf32> to vector<16x8xf32>
    %216 = vector.shape_cast %215 : vector<16x8xf32> to vector<2x8x8xf32>
    %217 = vector.extract_strided_slice %214 {offsets = [0, 8], sizes = [16, 8], strides = [1, 1]} : vector<16x96xf32> to vector<16x8xf32>
    %218 = vector.shape_cast %217 : vector<16x8xf32> to vector<2x8x8xf32>
    %219 = vector.extract_strided_slice %214 {offsets = [0, 16], sizes = [16, 8], strides = [1, 1]} : vector<16x96xf32> to vector<16x8xf32>
    %220 = vector.shape_cast %219 : vector<16x8xf32> to vector<2x8x8xf32>
    %221 = vector.extract_strided_slice %214 {offsets = [0, 24], sizes = [16, 8], strides = [1, 1]} : vector<16x96xf32> to vector<16x8xf32>
    %222 = vector.shape_cast %221 : vector<16x8xf32> to vector<2x8x8xf32>
    %223 = tpu.concatenate %216, %218, %220, %222 in 0 : vector<2x8x8xf32>, vector<2x8x8xf32>, vector<2x8x8xf32>, vector<2x8x8xf32> -> vector<8x8x8xf32>
    %224 = vector.extract_strided_slice %214 {offsets = [0, 32], sizes = [16, 8], strides = [1, 1]} : vector<16x96xf32> to vector<16x8xf32>
    %225 = vector.shape_cast %224 : vector<16x8xf32> to vector<2x8x8xf32>
    %226 = vector.extract_strided_slice %214 {offsets = [0, 40], sizes = [16, 8], strides = [1, 1]} : vector<16x96xf32> to vector<16x8xf32>
    %227 = vector.shape_cast %226 : vector<16x8xf32> to vector<2x8x8xf32>
    %228 = vector.extract_strided_slice %214 {offsets = [0, 48], sizes = [16, 8], strides = [1, 1]} : vector<16x96xf32> to vector<16x8xf32>
    %229 = vector.shape_cast %228 : vector<16x8xf32> to vector<2x8x8xf32>
    %230 = vector.extract_strided_slice %214 {offsets = [0, 56], sizes = [16, 8], strides = [1, 1]} : vector<16x96xf32> to vector<16x8xf32>
    %231 = vector.shape_cast %230 : vector<16x8xf32> to vector<2x8x8xf32>
    %232 = tpu.concatenate %225, %227, %229, %231 in 0 : vector<2x8x8xf32>, vector<2x8x8xf32>, vector<2x8x8xf32>, vector<2x8x8xf32> -> vector<8x8x8xf32>
    %233 = vector.extract_strided_slice %214 {offsets = [0, 64], sizes = [16, 8], strides = [1, 1]} : vector<16x96xf32> to vector<16x8xf32>
    %234 = vector.shape_cast %233 : vector<16x8xf32> to vector<2x8x8xf32>
    %235 = vector.extract_strided_slice %214 {offsets = [0, 72], sizes = [16, 8], strides = [1, 1]} : vector<16x96xf32> to vector<16x8xf32>
    %236 = vector.shape_cast %235 : vector<16x8xf32> to vector<2x8x8xf32>
    %237 = vector.extract_strided_slice %214 {offsets = [0, 80], sizes = [16, 8], strides = [1, 1]} : vector<16x96xf32> to vector<16x8xf32>
    %238 = vector.shape_cast %237 : vector<16x8xf32> to vector<2x8x8xf32>
    %239 = vector.extract_strided_slice %214 {offsets = [0, 88], sizes = [16, 8], strides = [1, 1]} : vector<16x96xf32> to vector<16x8xf32>
    %240 = vector.shape_cast %239 : vector<16x8xf32> to vector<2x8x8xf32>
    %241 = tpu.concatenate %234, %236, %238, %240 in 0 : vector<2x8x8xf32>, vector<2x8x8xf32>, vector<2x8x8xf32>, vector<2x8x8xf32> -> vector<8x8x8xf32>
    "tpu.trace_start"() <{level = 10 : i32, message = "bqd,bkd->bqk"}> : () -> ()
    %cst_58 = arith.constant dense<0.000000e+00> : vector<8x8x8xf32>
    %242 = tpu.matmul %223, %232, %cst_58 {dimension_numbers = #tpu.dot_dimension_numbers<[2], [2], [1], [1], [0, 0, 0, 1, 1, 1], [0], [0]>} : vector<8x8x8xf32>, vector<8x8x8xf32>, vector<8x8x8xf32> -> vector<8x8x8xf32>
    "tpu.trace_stop"() : () -> ()
    %cst_59 = arith.constant 0.353553385 : f32
    %243 = vector.broadcast %cst_59 : f32 to vector<8x8x8xf32>
    %244 = arith.mulf %242, %243 : vector<8x8x8xf32>
    %245 = arith.addf %244, %61 : vector<8x8x8xf32>
    %cst_60 = arith.constant dense<0xFF800000> : vector<8x8xf32>
    %246 = vector.multi_reduction <maximumf>, %245, %cst_60 [2] : vector<8x8x8xf32> to vector<8x8xf32>
    %247 = vector.shape_cast %246 : vector<8x8xf32> to vector<8x8x1xf32>
    %248 = vector.broadcast %247 : vector<8x8x1xf32> to vector<8x8x8xf32>
    %249 = arith.subf %245, %248 : vector<8x8x8xf32>
    %250 = math.exp %249 : vector<8x8x8xf32>
    %cst_61 = arith.constant dense<0.000000e+00> : vector<8x8xf32>
    %251 = vector.multi_reduction <add>, %250, %cst_61 [2] : vector<8x8x8xf32> to vector<8x8xf32>
    %252 = vector.shape_cast %251 : vector<8x8xf32> to vector<8x8x1xf32>
    %253 = vector.broadcast %252 : vector<8x8x1xf32> to vector<8x8x8xf32>
    %254 = arith.divf %250, %253 : vector<8x8x8xf32>
    "tpu.trace_start"() <{level = 10 : i32, message = "bqk,bkd->bqd"}> : () -> ()
    %cst_62 = arith.constant dense<0.000000e+00> : vector<8x8x8xf32>
    %255 = tpu.matmul %254, %241, %cst_62 {dimension_numbers = #tpu.dot_dimension_numbers<[2], [1], [1], [2], [0, 0, 0, 1, 1, 2], [0], [0]>} : vector<8x8x8xf32>, vector<8x8x8xf32>, vector<8x8x8xf32> -> vector<8x8x8xf32>
    "tpu.trace_stop"() : () -> ()
    %256 = vector.extract_strided_slice %255 {offsets = [0, 0, 0], sizes = [2, 8, 8], strides = [1, 1, 1]} : vector<8x8x8xf32> to vector<2x8x8xf32>
    %257 = vector.shape_cast %256 : vector<2x8x8xf32> to vector<16x8xf32>
    %258 = vector.extract_strided_slice %255 {offsets = [2, 0, 0], sizes = [2, 8, 8], strides = [1, 1, 1]} : vector<8x8x8xf32> to vector<2x8x8xf32>
    %259 = vector.shape_cast %258 : vector<2x8x8xf32> to vector<16x8xf32>
    %260 = vector.extract_strided_slice %255 {offsets = [4, 0, 0], sizes = [2, 8, 8], strides = [1, 1, 1]} : vector<8x8x8xf32> to vector<2x8x8xf32>
    %261 = vector.shape_cast %260 : vector<2x8x8xf32> to vector<16x8xf32>
    %262 = vector.extract_strided_slice %255 {offsets = [6, 0, 0], sizes = [2, 8, 8], strides = [1, 1, 1]} : vector<8x8x8xf32> to vector<2x8x8xf32>
    %263 = vector.shape_cast %262 : vector<2x8x8xf32> to vector<16x8xf32>
    %264 = tpu.concatenate %257, %259, %261, %263 in 1 : vector<16x8xf32>, vector<16x8xf32>, vector<16x8xf32>, vector<16x8xf32> -> vector<16x32xf32>
    %265 = vector.extract_strided_slice %208 {offsets = [0, 0], sizes = [32, 32], strides = [1, 1]} : vector<32x96xf32> to vector<32x32xf32>
    %cst_63 = arith.constant dense<0.000000e+00> : vector<16x32xf32>
    %266 = tpu.matmul %264, %265, %cst_63 {dimension_numbers = #tpu.dot_dimension_numbers<[1], [0], [0], [1], [0, 0, 1, 1], [], []>} : vector<16x32xf32>, vector<32x32xf32>, vector<16x32xf32> -> vector<16x32xf32>
    %267 = vector.extract_strided_slice %206 {offsets = [1, 0], sizes = [1, 32], strides = [1, 1]} : vector<8x128xf32> to vector<1x32xf32>
    %268 = vector.broadcast %267 : vector<1x32xf32> to vector<16x32xf32>
    %269 = arith.addf %266, %268 : vector<16x32xf32>
    %270 = arith.addf %269, %204 : vector<16x32xf32>
    %271 = vector.extract_strided_slice %206 {offsets = [2, 0], sizes = [1, 32], strides = [1, 1]} : vector<8x128xf32> to vector<1x32xf32>
    %272 = vector.extract_strided_slice %206 {offsets = [3, 0], sizes = [1, 32], strides = [1, 1]} : vector<8x128xf32> to vector<1x32xf32>
    %cst_64 = arith.constant dense<0.000000e+00> : vector<16xf32>
    %273 = vector.multi_reduction <add>, %270, %cst_64 [1] : vector<16x32xf32> to vector<16xf32>
    %274 = vector.shape_cast %273 : vector<16xf32> to vector<16x1xf32>
    %cst_65 = arith.constant 3.200000e+01 : f32
    %275 = vector.broadcast %cst_65 : f32 to vector<16x1xf32>
    %276 = arith.divf %274, %275 : vector<16x1xf32>
    %277 = vector.broadcast %276 : vector<16x1xf32> to vector<16x32xf32>
    %278 = arith.subf %270, %277 : vector<16x32xf32>
    %279 = vector.broadcast %276 : vector<16x1xf32> to vector<16x32xf32>
    %280 = arith.subf %270, %279 : vector<16x32xf32>
    %281 = arith.mulf %278, %280 : vector<16x32xf32>
    %cst_66 = arith.constant dense<0.000000e+00> : vector<16xf32>
    %282 = vector.multi_reduction <add>, %281, %cst_66 [1] : vector<16x32xf32> to vector<16xf32>
    %283 = vector.shape_cast %282 : vector<16xf32> to vector<16x1xf32>
    %cst_67 = arith.constant 3.200000e+01 : f32
    %284 = vector.broadcast %cst_67 : f32 to vector<16x1xf32>
    %285 = arith.divf %283, %284 : vector<16x1xf32>
    %286 = vector.broadcast %276 : vector<16x1xf32> to vector<16x32xf32>
    %287 = arith.subf %270, %286 : vector<16x32xf32>
    %cst_68 = arith.constant 9.99999996E-13 : f32
    %288 = vector.broadcast %cst_68 : f32 to vector<16x1xf32>
    %289 = arith.addf %285, %288 : vector<16x1xf32>
    %290 = math.rsqrt %289 : vector<16x1xf32>
    %291 = vector.broadcast %290 : vector<16x1xf32> to vector<16x32xf32>
    %292 = arith.mulf %287, %291 : vector<16x32xf32>
    %293 = vector.broadcast %271 : vector<1x32xf32> to vector<16x32xf32>
    %294 = arith.mulf %292, %293 : vector<16x32xf32>
    %295 = vector.broadcast %272 : vector<1x32xf32> to vector<16x32xf32>
    %296 = arith.addf %294, %295 : vector<16x32xf32>
    %297 = vector.extract_strided_slice %208 {offsets = [0, 32], sizes = [32, 64], strides = [1, 1]} : vector<32x96xf32> to vector<32x64xf32>
    %cst_69 = arith.constant dense<0.000000e+00> : vector<16x64xf32>
    %298 = tpu.matmul %296, %297, %cst_69 {dimension_numbers = #tpu.dot_dimension_numbers<[1], [0], [0], [1], [0, 0, 1, 1], [], []>} : vector<16x32xf32>, vector<32x64xf32>, vector<16x64xf32> -> vector<16x64xf32>
    %299 = vector.extract_strided_slice %206 {offsets = [4, 0], sizes = [1, 64], strides = [1, 1]} : vector<8x128xf32> to vector<1x64xf32>
    %300 = vector.broadcast %299 : vector<1x64xf32> to vector<16x64xf32>
    %301 = arith.addf %298, %300 : vector<16x64xf32>
    %cst_70 = arith.constant 5.000000e-01 : f32
    %302 = vector.broadcast %cst_70 : f32 to vector<16x64xf32>
    %303 = arith.mulf %302, %301 : vector<16x64xf32>
    %cst_71 = arith.constant 4.471500e-02 : f32
    %304 = vector.broadcast %cst_71 : f32 to vector<16x64xf32>
    %305 = arith.mulf %304, %301 : vector<16x64xf32>
    %306 = arith.mulf %305, %301 : vector<16x64xf32>
    %307 = arith.mulf %306, %301 : vector<16x64xf32>
    %308 = arith.addf %301, %307 : vector<16x64xf32>
    %cst_72 = arith.constant 0.797884583 : f32
    %309 = vector.broadcast %cst_72 : f32 to vector<16x64xf32>
    %310 = arith.mulf %309, %308 : vector<16x64xf32>
    %311 = math.tanh %310 : vector<16x64xf32>
    %cst_73 = arith.constant 1.000000e+00 : f32
    %312 = vector.broadcast %cst_73 : f32 to vector<16x64xf32>
    %313 = arith.addf %312, %311 : vector<16x64xf32>
    %314 = arith.mulf %303, %313 : vector<16x64xf32>
    %c1_74 = arith.constant 1 : index
    %c0_75 = arith.constant 0 : index
    %c0_76 = arith.constant 0 : index
    %315 = vector.load %arg6[%c1_74, %c0_75, %c0_76] : memref<2x64x32xf32, #tpu.memory_space<vmem>>, vector<1x64x32xf32>
    %316 = vector.shape_cast %315 : vector<1x64x32xf32> to vector<64x32xf32>
    %cst_77 = arith.constant dense<0.000000e+00> : vector<16x32xf32>
    %317 = tpu.matmul %314, %316, %cst_77 {dimension_numbers = #tpu.dot_dimension_numbers<[1], [0], [0], [1], [0, 0, 1, 1], [], []>} : vector<16x64xf32>, vector<64x32xf32>, vector<16x32xf32> -> vector<16x32xf32>
    %318 = vector.extract_strided_slice %206 {offsets = [5, 0], sizes = [1, 32], strides = [1, 1]} : vector<8x128xf32> to vector<1x32xf32>
    %319 = vector.broadcast %318 : vector<1x32xf32> to vector<16x32xf32>
    %320 = arith.addf %317, %319 : vector<16x32xf32>
    %321 = arith.addf %320, %296 : vector<16x32xf32>
    %322 = vector.extract_strided_slice %206 {offsets = [6, 0], sizes = [1, 32], strides = [1, 1]} : vector<8x128xf32> to vector<1x32xf32>
    %323 = vector.extract_strided_slice %206 {offsets = [7, 0], sizes = [1, 32], strides = [1, 1]} : vector<8x128xf32> to vector<1x32xf32>
    %cst_78 = arith.constant dense<0.000000e+00> : vector<16xf32>
    %324 = vector.multi_reduction <add>, %321, %cst_78 [1] : vector<16x32xf32> to vector<16xf32>
    %325 = vector.shape_cast %324 : vector<16xf32> to vector<16x1xf32>
    %cst_79 = arith.constant 3.200000e+01 : f32
    %326 = vector.broadcast %cst_79 : f32 to vector<16x1xf32>
    %327 = arith.divf %325, %326 : vector<16x1xf32>
    %328 = vector.broadcast %327 : vector<16x1xf32> to vector<16x32xf32>
    %329 = arith.subf %321, %328 : vector<16x32xf32>
    %330 = vector.broadcast %327 : vector<16x1xf32> to vector<16x32xf32>
    %331 = arith.subf %321, %330 : vector<16x32xf32>
    %332 = arith.mulf %329, %331 : vector<16x32xf32>
    %cst_80 = arith.constant dense<0.000000e+00> : vector<16xf32>
    %333 = vector.multi_reduction <add>, %332, %cst_80 [1] : vector<16x32xf32> to vector<16xf32>
    %334 = vector.shape_cast %333 : vector<16xf32> to vector<16x1xf32>
    %cst_81 = arith.constant 3.200000e+01 : f32
    %335 = vector.broadcast %cst_81 : f32 to vector<16x1xf32>
    %336 = arith.divf %334, %335 : vector<16x1xf32>
    %337 = vector.broadcast %327 : vector<16x1xf32> to vector<16x32xf32>
    %338 = arith.subf %321, %337 : vector<16x32xf32>
    %cst_82 = arith.constant 9.99999996E-13 : f32
    %339 = vector.broadcast %cst_82 : f32 to vector<16x1xf32>
    %340 = arith.addf %336, %339 : vector<16x1xf32>
    %341 = math.rsqrt %340 : vector<16x1xf32>
    %342 = vector.broadcast %341 : vector<16x1xf32> to vector<16x32xf32>
    %343 = arith.mulf %338, %342 : vector<16x32xf32>
    %344 = vector.broadcast %322 : vector<1x32xf32> to vector<16x32xf32>
    %345 = arith.mulf %343, %344 : vector<16x32xf32>
    %346 = vector.broadcast %323 : vector<1x32xf32> to vector<16x32xf32>
    %347 = arith.addf %345, %346 : vector<16x32xf32>
    %348 = vector.shape_cast %347 : vector<16x32xf32> to vector<2x8x32xf32>
    %349 = vector.extract_strided_slice %348 {offsets = [0, 0, 0], sizes = [2, 1, 32], strides = [1, 1, 1]} : vector<2x8x32xf32> to vector<2x1x32xf32>
    %350 = vector.shape_cast %349 : vector<2x1x32xf32> to vector<2x32xf32>
    %c0_83 = arith.constant 0 : index
    %c0_84 = arith.constant 0 : index
    %351 = vector.load %arg8[%c0_83, %c0_84] : memref<32x160xf32, #tpu.memory_space<vmem>>, vector<32x160xf32>
    %352 = vector.extract_strided_slice %351 {offsets = [0, 0], sizes = [32, 32], strides = [1, 1]} : vector<32x160xf32> to vector<32x32xf32>
    %cst_85 = arith.constant dense<0.000000e+00> : vector<2x32xf32>
    %353 = tpu.matmul %350, %352, %cst_85 {dimension_numbers = #tpu.dot_dimension_numbers<[1], [0], [0], [1], [0, 0, 1, 1], [], []>} : vector<2x32xf32>, vector<32x32xf32>, vector<2x32xf32> -> vector<2x32xf32>
    %354 = vector.extract_strided_slice %25 {offsets = [2, 0], sizes = [1, 32], strides = [1, 1]} : vector<8x128xf32> to vector<1x32xf32>
    %355 = vector.broadcast %354 : vector<1x32xf32> to vector<2x32xf32>
    %356 = arith.addf %353, %355 : vector<2x32xf32>
    %357 = math.tanh %356 : vector<2x32xf32>
    %358 = vector.extract_strided_slice %351 {offsets = [0, 32], sizes = [32, 128], strides = [1, 1]} : vector<32x160xf32> to vector<32x128xf32>
    %cst_86 = arith.constant dense<0.000000e+00> : vector<2x128xf32>
    %359 = tpu.matmul %357, %358, %cst_86 {dimension_numbers = #tpu.dot_dimension_numbers<[1], [0], [0], [1], [0, 0, 1, 1], [], []>} : vector<2x32xf32>, vector<32x128xf32>, vector<2x128xf32> -> vector<2x128xf32>
    %360 = vector.extract_strided_slice %25 {offsets = [3, 0], sizes = [1, 128], strides = [1, 1]} : vector<8x128xf32> to vector<1x128xf32>
    %361 = vector.broadcast %360 : vector<1x128xf32> to vector<2x128xf32>
    %362 = arith.addf %359, %361 : vector<2x128xf32>
    %c0_87 = arith.constant 0 : index
    %c0_88 = arith.constant 0 : index
    %363 = vector.load %arg9[%c0_87, %c0_88] : memref<2x128xf32, #tpu.memory_space<vmem>>, vector<2x128xf32>
    tpu.vector_store %arg9[%c0_87, %c0_88], %362 {strides = array<i32>} : memref<2x128xf32, #tpu.memory_space<vmem>>, vector<2x128xf32>,
    return
  }
}

</mosaic_0001>

<bundles_post_ra>
// kernel: sentiment_classifier_forward.1
= control target key start
LH: loop header
LB: loop body
LE: loop exit
PB: predicated region body
PF: predicated region fallthrough
CT: control target
= control target key end

     0   :  { %v5012_v3 = vmov 0   ;;  %s5807_s0 = inlined_call_operand.vmem [shape: s32[16,3], index: 0, kind: input, shape index: {}]   ;;  %s5808_s1 = inlined_call_operand.vmem [shape: s32[2,8], index: 1, kind: input, shape index: {}]   ;;  %s5809_s2 = inlined_call_operand.vmem [shape: f32[118,32], index: 2, kind: input, shape index: {}]   ;;  %s5810_s3 = inlined_call_operand.vmem [shape: f32[8,128], index: 3, kind: input, shape index: {}]   ;;  %s5811_s4 = inlined_call_operand.vmem [shape: f32[2,32,96], index: 4, kind: input, shape index: {}]   ;;  %s5812_s5 = inlined_call_operand.vmem [shape: f32[2,32,96], index: 5, kind: input, shape index: {}]   ;;  %s5813_s6 = inlined_call_operand.vmem [shape: f32[2,64,32], index: 6, kind: input, shape index: {}]   ;;  %s5814_s7 = inlined_call_operand.vmem [shape: f32[2,8,128], index: 7, kind: input, shape index: {}]   ;;  %s5815_s8 = inlined_call_operand.vmem [shape: f32[32,160], index: 8, kind: input, shape index: {}]   ;;  %s5816_s9 = inlined_call_operand.hbm [shape: f32[2,128], index: 9, kind: output, shape index: {}]  }
   0x1   :  { %v34_v0 = vld [vmem:[%s5807_s0 + $0x8] sm:$0xff]  ;;  %v33_v1 = vld [vmem:[%s5807_s0] sm:$0xff]  ;;  %4849 = vset.pattern.permute.xlu1 %v5012_v3  ;;  %4847 = vset.pattern.permute.xlu0 %v5012_v3  ;;  %v83_v5 = vld [vmem:[%s5809_s2 + $0x10] sm:$0xff] }
   0x2   :  { %v81_v2 = vld [vmem:[%s5809_s2] sm:$0xff]  ;;  %v82_v4 = vld [vmem:[%s5809_s2 + $0x8] sm:$0xff]  ;;  %41 = vperm.xlu1 %4849, %v34_v0   ;;  %38 = vperm.xlu0 %4847, %v33_v1   ;;  %v84_v7 = vld [vmem:[%s5809_s2 + $0x18] sm:$0xff]  ;;  %v50_v8 = vadd.s32 100, %v34_v0  ;;  %v49_v9 = vadd.s32 100, %v33_v1 }
   0x3   :  { %v4711_v6 = vpack.c.bf16 %v82_v4, %v81_v2  ;;  %v85_v10 = vld [vmem:[%s5809_s2 + $0x20] sm:$0xff]  ;;  %v86_v11 = vld [vmem:[%s5809_s2 + $0x28] sm:$0xff]  ;;  %v4715_v12 = vpack.c.bf16 %v84_v7, %v83_v5 }
   0x5   :  { %4712 = vmatprep.subr.bf16.mxu0 %v4711_v6 }
   0x6   :  { %4714 = vmatpush3.bf16.msra.mxu0 %v4711_v6 }
   0x7   :  { %14 = vsyncpa [#allocation3], 0  ;;  %v5013_v13 = vmov 2   ;;  %v4719_v14 = vpack.c.bf16 %v86_v11, %v85_v10  ;;  %v87_v15 = vld [vmem:[%s5809_s2 + $0x30] sm:$0xff]  ;;  %v88_v16 = vld [vmem:[%s5809_s2 + $0x38] sm:$0xff]  ;;  %v65_v17 = vadd.s32 116, %v33_v1  ;;  %4716 = vmatprep.subr.bf16.mxu0 %v4715_v12  ;;  %v35_v32 = vlaneseq }
   0x8   :  { %4850 = vset.pattern.permute.xlu1 %v5013_v13  ;;  %4848 = vset.pattern.permute.xlu0 %v5013_v13  ;;  %v66_v18 = vadd.s32 116, %v34_v0  ;;  %v4723_v19 = vpack.c.bf16 %v88_v16, %v87_v15  ;;  %v5014_v20 = vmov 1   ;;  %v89_v21 = vld [vmem:[%s5809_s2 + $0x40] sm:$0xff]  ;;  %v90_v22 = vld [vmem:[%s5809_s2 + $0x48] sm:$0xff]  ;;  %v91_v24 = vld [vmem:[%s5809_s2 + $0x50] sm:$0xff]  ;;  %vm103_vm0 = vcmask 1045504  }
   0x9   :  { %55 = vperm.xlu1 %4850, %v50_v8   ;;  %52 = vperm.xlu0 %4848, %v49_v9   ;;  %v4727_v23 = vpack.c.bf16 %v90_v22, %v89_v21  ;;  %v92_v25 = vld [vmem:[%s5809_s2 + $0x58] sm:$0xff]  ;;  %v93_v27 = vld [vmem:[%s5809_s2 + $0x60] sm:$0xff]  ;;  %v94_v28 = vld [vmem:[%s5809_s2 + $0x68] sm:$0xff]  ;;  %v5015_v31 = vmov 0.0   ;;  %v36_v35 = vand.u32 127, %v35_v32  ;;  %vm96_vm7 = vcmask 965632  }
   0xa   :  { %4718 = vmatpush3.bf16.msra.mxu0 %v4715_v12  ;;  %v4731_v26 = vpack.c.bf16 %v92_v25, %v91_v24  ;;  %v4735_v29 = vpack.c.bf16 %v94_v28, %v93_v27  ;;  %v95_v30 = vld [vmem:[%s5809_s2 + $0x70] sm:$0x3f]  ;;  %vm183_vm8 = vcmask 261120   ;;  %v265_v0 = vld [vmem:[%s5811_s4] sm:$0xff]  ;;  %v266_v1 = vld [vmem:[%s5811_s4 + $0x8] sm:$0xff]  ;;  %v5155_v12 = vshrl.u32 %v35_v32, 7 }
   0xb   :  { %4720 = vmatprep.subr.bf16.mxu0 %v4719_v14  ;;  %v267_v2 = vld [vmem:[%s5811_s4 + $0x10] sm:$0xff]  ;;  %v4739_v3 = vpack.c.bf16 %v266_v1, %v265_v0  ;;  %v268_v4 = vld [vmem:[%s5811_s4 + $0x18] sm:$0xff]  ;;  %vm5016_vm9 = vmmov 0   ;;  %s5017_s10 = smov 120   ;;  %s5018_s11 = smov 104   ;;  %vm370_vm10 = vcmask 64512  }
   0xc   :  { %v4743_v5 = vpack.c.bf16 %v268_v4, %v267_v2  ;;  %v5158_v13 = vsub.s32 0, %v5155_v12  ;;  %v5164_v15 = vsub.s32 1, %v5155_v12  ;;  %s5019_s12 = smov 112   ;;  %s5020_s13 = smov 96   ;;  %vm1715_vm11 = vcmask 130048  }
   0xd   :  { %4851 = vset.pattern.permute.xlu1 %v5014_v20  ;;  %4852 = vset.pattern.permute.xlu0 %v5014_v20  ;;  %s5023_s0 = smov 8   ;;  %s5024_s23 = smov 16   ;;  %vm1718_vm12 = vcmask 195584   ;;  %vm1977_vm13 = vcmask 523264   ;;  %vm4056_vm14 = vcmask 785408   ;;  %vm3953_vm15 = vcmask 1041409  }
   0xe   :  { %68 = vperm.xlu1 %4851, %v65_v17   ;;  %71 = vperm.xlu0 %4852, %v66_v18   ;;  %s5025_s24 = smov 24   ;;  %s5027_s20 = smov [#allocation2]  }
   0xf   :  { %4722 = vmatpush3.bf16.msra.mxu0 %v4719_v14  ;;  %4740 = vmatprep.subr.bf16.mxu1 %v4739_v3  ;;  %v182_v14 = vld [vmem:[%s5810_s3] sm:$0xff]  ;;  %s4145_s21 = sshll.u32 %s5027_s20, 4  ;;  %s4146_s21 = int_to_ptr.vmem [resolvable:$true] %s4145_s21 }
  0x10   :  { %4724 = vmatprep.subr.bf16.mxu0 %v4723_v19  ;;  %4742 = vmatpush3.bf16.msra.mxu1 %v4739_v3  ;;  %v214_v16 = vrot.slane %v182_v14, %v5158_v13  ;;  %v220_v21 = vrot.slane %v182_v14, %v5164_v15  ;;  %s4988_s22 = scalar_lea.vmem %s4146_s21, 32  ;;  %p4993_p1 = scmp.lt.s32.totalorder %s4146_s21, %s4146_s21 }
  0x11   :  { %4744 = vmatprep.subr.bf16.mxu1 %v4743_v5  ;;  %p4989_p0 = scmp.ne.s32.totalorder %s4146_s21, %s4988_s22  ;;  %p4994_p2 = scmp.lt.s32.totalorder %s4988_s22, %s4988_s22 }
  0x13   :  { %4726 = vmatpush3.bf16.msra.mxu0 %v4723_v19  ;;  %p4995_p3 = por %p4994_p2, %p4993_p1 }
  0x14   :  { %4728 = vmatprep.subr.bf16.mxu0 %v4727_v23  ;;  %4746 = vmatpush3.bf16.msra.mxu1 %v4743_v5 }
  0x15   :  { %4436 = vmatprep.subr.mxu1 %v5015_v31  ;;  %p4996_p4 = pnand %p4995_p3, %p4989_p0 }
  0x17   :  { %4730 = vmatpush3.bf16.msra.mxu0 %v4727_v23 }
  0x18   :  { %4732 = vmatprep.subr.bf16.mxu0 %v4731_v26 }
  0x1b   :  { %4734 = vmatpush3.bf16.msra.mxu0 %v4731_v26  ;;  %v5179_v26 = vld [vmem:[%s5814_s7] sm:$0xff] }
  0x1c   :  { %4736 = vmatprep.subr.bf16.mxu0 %v4735_v29  ;;  %v272_v27 = vrot.slane %v5179_v26, %v5158_v13 }
  0x1f   :  { %4738 = vmatpush3.bf16.msra.mxu0 %v4735_v29 }
  0x20   :  { %4420 = vmatprep.subr.msk.mxu0 %vm103_vm0, %v95_v30 }
  0x23   :  { %4421 = vmatpush3.msk.msra.mxu0 %vm103_vm0, %v95_v30 }
  0x24   :  { %4466 = vmatprep.subr.mxu0 %v5015_v31 }
  0x81   :  { %v42_v33 = vpop.permute.xlu1 %41  ;;  %v39_v34 = vpop.permute.xlu0 %38 }
  0x82   :  { %vm44_vm3 = vcmp.eq.s32.totalorder %v36_v35, %v42_v33  ;;  %vm43_vm4 = vcmp.eq.s32.totalorder %v36_v35, %v39_v34 }
  0x83   :  { %v4154_v40 = vsel %vm44_vm3, 1.0, %v5015_v31  ;;  %v4153_v41 = vsel %vm43_vm4, 1.0, %v5015_v31 }
  0x88   :  { %v56_v36 = vpop.permute.xlu1 %55  ;;  %v53_v37 = vpop.permute.xlu0 %52 }
  0x89   :  { %vm58_vm1 = vcmp.eq.s32.totalorder %v36_v35, %v56_v36  ;;  %vm57_vm2 = vcmp.eq.s32.totalorder %v36_v35, %v53_v37 }
  0x8a   :  { %v4156_v38 = vsel %vm58_vm1, 1.0, %v5015_v31  ;;  %v4155_v39 = vsel %vm57_vm2, 1.0, %v5015_v31 }
  0x8b   :  { %v64_v44 = vadd.f32 %v4156_v38, %v4154_v40  ;;  %v63_v45 = vadd.f32 %v4155_v39, %v4153_v41 }
  0x8d   :  { %v69_v42 = vpop.permute.xlu1 %68  ;;  %v72_v43 = vpop.permute.xlu0 %71 }
  0x8e   :  { %vm73_vm5 = vcmp.eq.s32.totalorder %v36_v35, %v69_v42  ;;  %vm74_vm6 = vcmp.eq.s32.totalorder %v36_v35, %v72_v43 }
  0x8f   :  { %v4158_v46 = vsel %vm74_vm6, 1.0, %v5015_v31  ;;  %v4157_v47 = vsel %vm73_vm5, 1.0, %v5015_v31 }
  0x90   :  { %v80_v48 = vadd.f32 %v4158_v46, %v64_v44  ;;  %v79_v49 = vadd.f32 %v4157_v47, %v63_v45  ;;  %v223_v47 = vld [vmem:[%s5808_s1] sm:$0x3]  ;;  %s5022_s1 = smov 64  }
  0x92   :  { %4422 = vmatprep.mubr.msk.f32.mxu0 %vm96_vm7, %v79_v49  ;;  %v5021_v49 = vmov 1966171168  }
  0x93   :  { %4423 = vmatmul.mubr.msk.f32.vlgmr.msra.gmra.mrb[0].mxu0 %vm96_vm7, %v80_v48  ;;  %v224_v48 = vcvt.s32.f32 %v223_v47 }
  0x94   :  { %4468 = vmatprep.mubr.msk.f32.mxu0 %vm5016_vm9, %v5015_v31 }
 0x166   :  { %v4424_v50 = vpop.f32.mrb[0].mxu0 }
 0x167   :  { %v173_v51 = vpop.f32.mrb[1].mxu0  ;;  %v187_v52 = vsel %vm183_vm8, %v4424_v50, 0.0 }
 0x168   :  { %188 = vadd.xlane.f32.xlu0 %v187_v52  ;;  %v184_v53 = vsel %vm183_vm8, %v173_v51, 0.0 }
 0x169   :  { %185 = vadd.xlane.f32.xlu1 %v184_v53 }
 0x1f5   :  { %v189_v54 = vpop.xlane.xlu0 %188 }
 0x1f6   :  { %v192_v55 = vmul.f32 0.03125, %v189_v54  ;;  %v186_v56 = vpop.xlane.xlu1 %185 }
 0x1f7   :  { %v191_v57 = vmul.f32 0.03125, %v186_v56 }
 0x1f8   :  { %v194_v58 = vsub.f32 %v4424_v50, %v192_v55  ;;  %v229_v50 = vunpack.c.l.s4 %v5021_v49 }
 0x1f9   :  { %v193_v59 = vsub.f32 %v173_v51, %v191_v57  ;;  %v225_v51 = vsub.f32 1.0, %v224_v48 }
 0x1fa   :  { %v196_v60 = vmul.f32 %v194_v58, %v194_v58  ;;  %v230_v52 = vunpack.c.0.s8 %v229_v50 }
 0x1fb   :  { %v195_v61 = vmul.f32 %v193_v59, %v193_v59  ;;  %v226_v53 = vmul.f32 -10000.0, %v225_v51 }
 0x1fc   :  { %v200_v62 = vsel %vm183_vm8, %v196_v60, 0.0  ;;  %v233_v54 = vsub.s32 %v230_v52, %v5155_v12 }
 0x1fd   :  { %201 = vadd.xlane.f32.xlu0 %v200_v62  ;;  %v197_v63 = vsel %vm183_vm8, %v195_v61, 0.0 }
 0x1fe   :  { %198 = vadd.xlane.f32.xlu1 %v197_v63  ;;  %v234_v55 = vrot.slane %v226_v53, %v233_v54 }
 0x200   :  { %v242_v56 = vrot.slane %v234_v55, %v233_v54 }
 0x202   :  { %v5284_v57 = vrot.slane %v242_v56, %v5158_v13 }
 0x28a   :  { %v202_v6 = vpop.xlane.xlu0 %201 }
 0x28b   :  { %v204_v7 = vmul.f32 0.03125, %v202_v6  ;;  %v199_v8 = vpop.xlane.xlu1 %198 }
 0x28c   :  { %v203_v9 = vmul.f32 0.03125, %v199_v8 }
 0x28d   :  { %v206_v10 = vadd.f32 1e-12, %v204_v7 }
 0x28e   :  { %v205_v11 = vadd.f32 1e-12, %v203_v9 }
 0x28f   :  { %4893 = vrsqrt.f32 %v206_v10 }
 0x290   :  { %4895 = vrsqrt.f32 %v205_v11 }
 0x299   :  { %v4894_v17 = vpop.eup %4893 }
 0x29a   :  { %v4896_v18 = vpop.eup %4895  ;;  %v210_v19 = vmul.f32 %v4894_v17, %v194_v58  ;;  %v235_v58 = vcombine.high %v234_v55, %v234_v55 }
 0x29b   :  { %v209_v20 = vmul.f32 %v4896_v18, %v193_v59 }
 0x29c   :  { %v216_v22 = vmul.f32 %v214_v16, %v210_v19  ;;  %v249_v63 = vrot.slane %v235_v58, %v233_v54 }
 0x29d   :  { %v215_v23 = vmul.f32 %v214_v16, %v209_v20 }
 0x29e   :  { %v5170_v25 = vadd.f32 %v220_v21, %v216_v22  ;;  %v5289_v1 = vrot.slane %v249_v63, %v5158_v13 }
 0x29f   :  { %v5168_v24 = vadd.f32 %v220_v21, %v215_v23 }
 0x2a1   :  { %4433 = vmatprep.mubr.msk.f32.mxu1 %vm183_vm8, %v5168_v24 }
 0x2a2   :  { %4434 = vmatmul.mubr.msk.f32.vlgmr.msra.gmra.mrb[0].mxu1 %vm183_vm8, %v5170_v25 }
 0x2a3   :  { %4438 = vmatprep.mubr.msk.f32.mxu1 %vm5016_vm9, %v5015_v31 }
 0x375   :  { %v4435_v28 = vpop.f32.mrb[0].mxu1 }
 0x376   :  { %v5187_v29 = vadd.f32 %v4435_v28, %v272_v27  ;;  %v345_v30 = vpop.f32.mrb[1].mxu1 }
 0x377   :  { %v5189_v32 = vadd.f32 %v345_v30, %v272_v27 }
 0x378   :  { %358 = vrot.lane.b32.xlu0 %v5187_v29, %s5017_s10 }
 0x379   :  { %356 = vrot.lane.b32.xlu1 %v5189_v32, %s5017_s10 }
 0x37c   :  { %364 = vrot.lane.b32.xlu0 %v5189_v32, %s5018_s11 }
 0x37d   :  { %360 = vrot.lane.b32.xlu1 %v5189_v32, %s5019_s12 }
 0x380   :  { %368 = vrot.lane.b32.xlu0 %v5189_v32, %s5020_s13 }
 0x381   :  { %362 = vrot.lane.b32.xlu1 %v5187_v29, %s5019_s12 }
 0x385   :  { %366 = vrot.lane.b32.xlu1 %v5187_v29, %s5018_s11 }
 0x389   :  { %445 = vrot.lane.b32.xlu1 %v5187_v29, %s5020_s13 }
 0x3ea   :  { %v5207_v33 = vpop.permute.xlu0 %358 }
 0x3eb   :  { %597 = vrot.lane.b32.xlu1 %v5207_v33, %s5020_s13  ;;  %v5211_v34 = vpop.permute.xlu1 %356 }
 0x3ec   :  { %521 = vrot.lane.b32.xlu0 %v5211_v34, %s5020_s13 }
 0x3ee   :  { %v5215_v35 = vpop.permute.xlu0 %364 }
 0x3ef   :  { %v5217_v36 = vpop.permute.xlu1 %360 }
 0x3f0   :  { %673 = vrot.lane.b32.xlu0 %v5217_v36, %s5020_s13 }
 0x3f2   :  { %v369_v37 = vpop.permute.xlu0 %368 }
 0x3f3   :  { %4437 = vmatpush3.xpose.msk.msra.mxu1 %vm370_vm10, %v369_v37  ;;  %v5222_v38 = vpop.permute.xlu1 %362 }
 0x3f4   :  { %825 = vrot.lane.b32.xlu0 %v5215_v35, %s5020_s13  ;;  %749 = vrot.lane.b32.xlu1 %v5222_v38, %s5020_s13 }
 0x3f5   :  { %4441 = vmatprep.subr.mxu1 %v5015_v31 }
 0x3f6   :  { %4439 = vmatmul.mubr.msk.f32.vlgmr.msra.gmra.mrb[2].mxu1 %vm370_vm10, %v5189_v32 }
 0x3f7   :  { %v5231_v39 = vpop.permute.xlu1 %366  ;;  %4443 = vmatprep.mubr.msk.f32.mxu1 %vm5016_vm9, %v5015_v31 }
 0x3f8   :  { %901 = vrot.lane.b32.xlu1 %v5231_v39, %s5020_s13 }
 0x3fb   :  { %v446_v40 = vpop.permute.xlu1 %445 }
 0x3fc   :  { %4442 = vmatpush3.xpose.msk.msra.mxu1 %vm370_vm10, %v446_v40 }
 0x3fd   :  { %4446 = vmatprep.subr.mxu1 %v5015_v31 }
 0x3ff   :  { %4444 = vmatmul.mubr.msk.f32.vlgmr.msra.gmra.mrb[4].mxu1 %vm370_vm10, %v5187_v29 }
 0x400   :  { %4448 = vmatprep.mubr.msk.f32.mxu1 %vm5016_vm9, %v5015_v31 }
 0x45d   :  { %v598_v42 = vpop.permute.xlu1 %597 }
 0x45e   :  { %v522_v41 = vpop.permute.xlu0 %521 }
 0x45f   :  { %4447 = vmatpush3.xpose.msk.msra.mxu1 %vm370_vm10, %v522_v41 }
 0x460   :  { %4451 = vmatprep.subr.mxu1 %v5015_v31 }
 0x462   :  { %v674_v43 = vpop.permute.xlu0 %673  ;;  %4449 = vmatmul.mubr.msk.f32.vlgmr.msra.gmra.mrb[6].mxu1 %vm370_vm10, %v5211_v34 }
 0x463   :  { %4452 = vmatpush3.xpose.msk.msra.mxu1 %vm370_vm10, %v598_v42  ;;  %4453 = vmatprep.mubr.msk.f32.mxu1 %vm5016_vm9, %v5015_v31 }
 0x464   :  { %4456 = vmatprep.subr.mxu1 %v5015_v31 }
 0x466   :  { %v826_v44 = vpop.permute.xlu0 %825  ;;  %4454 = vmatmul.mubr.msk.f32.vlgmr.msra.gmra.mrb[8].mxu1 %vm370_vm10, %v5207_v33  ;;  %v750_v45 = vpop.permute.xlu1 %749 }
 0x467   :  { %4457 = vmatpush3.xpose.msk.msra.mxu1 %vm370_vm10, %v674_v43  ;;  %4467 = vmatpush3.xpose.msk.msra.mxu0 %vm370_vm10, %v826_v44 }
 0x468   :  { %4458 = vmatprep.mubr.msk.f32.mxu1 %vm5016_vm9, %v5015_v31  ;;  %4461 = vmatprep.subr.mxu1 %v5015_v31 }
 0x469   :  { %4476 = vmatprep.subr.mxu0 %v5015_v31 }
 0x46a   :  { %4459 = vmatmul.mubr.msk.f32.vlgmr.msra.gmra.mrb[10].mxu1 %vm370_vm10, %v5217_v36  ;;  %4469 = vmatmul.mubr.msk.f32.vlgmr.msra.gmra.mrb[2].mxu0 %vm370_vm10, %v5215_v35  ;;  %v902_v46 = vpop.permute.xlu1 %901 }
 0x46b   :  { %4462 = vmatpush3.xpose.msk.msra.mxu1 %vm370_vm10, %v750_v45  ;;  %4463 = vmatprep.mubr.msk.f32.mxu1 %vm5016_vm9, %v5015_v31 }
 0x46c   :  { %4471 = vmatprep.subr.mxu1 %v5015_v31  ;;  %4478 = vmatprep.mubr.msk.f32.mxu0 %vm5016_vm9, %v5015_v31 }
 0x46e   :  { %4464 = vmatmul.mubr.msk.f32.vlgmr.msra.gmra.mrb[12].mxu1 %vm370_vm10, %v5222_v38 }
 0x46f   :  { %4472 = vmatpush3.xpose.msk.msra.mxu1 %vm370_vm10, %v902_v46  ;;  %4473 = vmatprep.mubr.msk.f32.mxu1 %vm5016_vm9, %v5015_v31 }
 0x470   :  { %4481 = vmatprep.subr.mxu1 %v5015_v31 }
 0x472   :  { %4474 = vmatmul.mubr.msk.f32.vlgmr.msra.gmra.mrb[14].mxu1 %vm370_vm10, %v5231_v39 }
 0x473   :  { %4483 = vmatprep.mubr.msk.f32.mxu1 %vm5016_vm9, %v5015_v31 }
 0x4c9   :  { %v441_v59 = vpop.f32.mrb[2].mxu1 }
 0x4ca   :  { %v977_v60 = vmul.f32 0.35355338, %v441_v59  ;;  %v4440_v61 = vpop.f32.mrb[3].mxu1 }
 0x4cc   :  { %v985_v62 = vadd.f32 %v977_v60, %v5284_v57 }
 0x4ce   :  { %v993_v0 = vsel %vm370_vm10, %v985_v62, -inf }
 0x4cf   :  { %994 = vmax.xlane.f32.xlu0 %v993_v0 }
 0x4d2   :  { %v517_v2 = vpop.f32.mrb[4].mxu1 }
 0x4d3   :  { %v978_v3 = vmul.f32 0.35355338, %v517_v2  ;;  %v4445_v4 = vpop.f32.mrb[5].mxu1 }
 0x4d5   :  { %v986_v5 = vadd.f32 %v978_v3, %v5289_v1 }
 0x4d7   :  { %v996_v6 = vsel %vm370_vm10, %v986_v5, -inf }
 0x4d8   :  { %997 = vmax.xlane.f32.xlu1 %v996_v6 }
 0x535   :  { %v593_v7 = vpop.f32.mrb[6].mxu1 }
 0x536   :  { %v979_v8 = vmul.f32 0.35355338, %v593_v7  ;;  %v4450_v9 = vpop.f32.mrb[7].mxu1 }
 0x538   :  { %v987_v10 = vadd.f32 %v979_v8, %v5284_v57 }
 0x539   :  { %v669_v11 = vpop.f32.mrb[8].mxu1 }
 0x53a   :  { %v980_v14 = vmul.f32 0.35355338, %v669_v11  ;;  %v4455_v16 = vpop.f32.mrb[9].mxu1  ;;  %v999_v17 = vsel %vm370_vm10, %v987_v10, -inf }
 0x53b   :  { %1000 = vmax.xlane.f32.xlu0 %v999_v17 }
 0x53c   :  { %v988_v18 = vadd.f32 %v980_v14, %v5289_v1 }
 0x53d   :  { %v745_v19 = vpop.f32.mrb[10].mxu1  ;;  %v897_v20 = vpop.f32.mrb[2].mxu0 }
 0x53e   :  { %v981_v21 = vmul.f32 0.35355338, %v745_v19  ;;  %v983_v22 = vmul.f32 0.35355338, %v897_v20  ;;  %v4460_v23 = vpop.f32.mrb[11].mxu1  ;;  %v4470_v27 = vpop.f32.mrb[3].mxu0 }
 0x53f   :  { %v1002_v28 = vsel %vm370_vm10, %v988_v18, -inf }
 0x540   :  { %1003 = vmax.xlane.f32.xlu0 %v1002_v28  ;;  %v989_v30 = vadd.f32 %v981_v21, %v5284_v57  ;;  %v991_v43 = vadd.f32 %v983_v22, %v5284_v57 }
 0x541   :  { %v821_v37 = vpop.f32.mrb[12].mxu1 }
 0x542   :  { %v982_v40 = vmul.f32 0.35355338, %v821_v37  ;;  %v4465_v41 = vpop.f32.mrb[13].mxu1  ;;  %v1005_v42 = vsel %vm370_vm10, %v989_v30, -inf  ;;  %v1011_v48 = vsel %vm370_vm10, %v991_v43, -inf }
 0x543   :  { %1006 = vmax.xlane.f32.xlu1 %v1005_v42 }
 0x544   :  { %v990_v44 = vadd.f32 %v982_v40, %v5289_v1 }
 0x545   :  { %v973_v45 = vpop.f32.mrb[14].mxu1 }
 0x546   :  { %v984_v46 = vmul.f32 0.35355338, %v973_v45  ;;  %v4475_v47 = vpop.f32.mrb[15].mxu1  ;;  %v1008_v49 = vsel %vm370_vm10, %v990_v44, -inf }
 0x547   :  { %1012 = vmax.xlane.f32.xlu1 %v1011_v48  ;;  %1009 = vmax.xlane.f32.xlu0 %v1008_v49 }
 0x548   :  { %v992_v50 = vadd.f32 %v984_v46, %v5289_v1 }
 0x54a   :  { %v1014_v51 = vsel %vm370_vm10, %v992_v50, -inf }
 0x54b   :  { %1015 = vmax.xlane.f32.xlu0 %v1014_v51 }
 0x558   :  { %1081 = vrot.lane.b32.xlu1 %v5189_v32, %s5022_s1 }
 0x55c   :  { %1233 = vrot.lane.b32.xlu1 %v5211_v34, %s5022_s1  ;;  %v995_v54 = vpop.xlane.xlu0 %994 }
 0x55d   :  { %v1017_v55 = vsub.f32 %v985_v62, %v995_v54 }
 0x55f   :  { %v1025_v56 = vmul.f32 1.442695, %v1017_v55 }
 0x560   :  { %1309 = vrot.lane.b32.xlu1 %v5207_v33, %s5022_s1 }
 0x561   :  { %1157 = vrot.lane.b32.xlu0 %v5187_v29, %s5022_s1 }
 0x564   :  { %1461 = vrot.lane.b32.xlu1 %v5222_v38, %s5022_s1 }
 0x565   :  { %1385 = vrot.lane.b32.xlu0 %v5217_v36, %s5022_s1  ;;  %v998_v52 = vpop.xlane.xlu1 %997 }
 0x566   :  { %v1018_v53 = vsub.f32 %v986_v5, %v998_v52 }
 0x568   :  { %v1027_v32 = vmul.f32 1.442695, %v1018_v53 }
 0x56a   :  { %4897 = vpow2.f32 %v1027_v32 }
 0x56b   :  { %4899 = vpow2.f32 %v1025_v56 }
 0x574   :  { %v5317_v34 = vpop.eup %4897 }
 0x575   :  { %v1044_v33 = vsel %vm370_vm10, %v5317_v34, 0.0  ;;  %v5321_v29 = vpop.eup %4899 }
 0x576   :  { %v1041_v38 = vsel %vm370_vm10, %v5321_v29, 0.0 }
 0x584   :  { %1045 = vadd.xlane.f32.xlu0 %v1044_v33 }
 0x588   :  { %1042 = vadd.xlane.f32.xlu1 %v1041_v38 }
 0x5c8   :  { %v1001_v36 = vpop.xlane.xlu0 %1000 }
 0x5c9   :  { %v1019_v58 = vsub.f32 %v987_v10, %v1001_v36 }
 0x5cb   :  { %v1029_v59 = vmul.f32 1.442695, %v1019_v58 }
 0x5cd   :  { %4901 = vpow2.f32 %v1029_v59  ;;  %v1004_v60 = vpop.xlane.xlu0 %1003 }
 0x5ce   :  { %v1020_v61 = vsub.f32 %v988_v18, %v1004_v60 }
 0x5d0   :  { %v1031_v62 = vmul.f32 1.442695, %v1020_v61  ;;  %v1007_v63 = vpop.xlane.xlu1 %1006 }
 0x5d1   :  { %v1021_v0 = vsub.f32 %v989_v30, %v1007_v63 }
 0x5d2   :  { %4903 = vpow2.f32 %v1031_v62 }
 0x5d3   :  { %v1033_v9 = vmul.f32 1.442695, %v1021_v0 }
 0x5d4   :  { %v1010_v2 = vpop.xlane.xlu0 %1009  ;;  %v1013_v3 = vpop.xlane.xlu1 %1012 }
 0x5d5   :  { %v1022_v4 = vsub.f32 %v990_v44, %v1010_v2  ;;  %v1023_v5 = vsub.f32 %v991_v43, %v1013_v3 }
 0x5d7   :  { %v4902_v6 = vpop.eup %4901  ;;  %v1035_v7 = vmul.f32 1.442695, %v1022_v4  ;;  %v1037_v8 = vmul.f32 1.442695, %v1023_v5 }
 0x5d8   :  { %v1016_v11 = vpop.xlane.xlu0 %1015  ;;  %v1082_v14 = vpop.permute.xlu1 %1081  ;;  %v1047_v10 = vsel %vm370_vm10, %v4902_v6, 0.0 }
 0x5d9   :  { %4905 = vpow2.f32 %v1035_v7  ;;  %v1024_v16 = vsub.f32 %v992_v50, %v1016_v11  ;;  %1048 = vadd.xlane.f32.xlu1 %v1047_v10  ;;  %4477 = vmatpush3.msra.mxu0 %v1082_v14  ;;  %v262_v7 = vld [vmem:[%s5812_s5 + $0x8] sm:$0xff]  ;;  %v5377_v14 = vld [vmem:[%s5812_s5 + $0x10] sm:$0xff]  ;;  %v264_v10 = vld [vmem:[%s5812_s5 + $0x18] sm:$0xff] }
 0x5da   :  { %4907 = vpow2.f32 %v1037_v8  ;;  %4486 = vmatprep.subr.mxu0 %v5015_v31 }
 0x5db   :  { %v1039_v17 = vmul.f32 1.442695, %v1024_v16  ;;  %4909 = vpow2.f32 %v1033_v9 }
 0x5dc   :  { %v4904_v18 = vpop.eup %4903  ;;  %v1158_v19 = vpop.permute.xlu0 %1157 }
 0x5dd   :  { %4911 = vpow2.f32 %v1039_v17  ;;  %4482 = vmatpush3.msra.mxu1 %v1158_v19  ;;  %v1050_v20 = vsel %vm370_vm10, %v4904_v18, 0.0  ;;  %v1234_v41 = vpop.permute.xlu1 %1233  ;;  %v4751_v17 = vpack.c.bf16 %v264_v10, %v5377_v14 }
 0x5de   :  { %1051 = vadd.xlane.f32.xlu0 %v1050_v20  ;;  %4491 = vmatprep.subr.mxu1 %v5015_v31 }
 0x5e0   :  { %v1386_v43 = vpop.permute.xlu0 %1385 }
 0x5e1   :  { %v1310_v42 = vpop.permute.xlu1 %1309 }
 0x5e3   :  { %v4906_v21 = vpop.eup %4905 }
 0x5e4   :  { %v5329_v22 = vpop.eup %4907  ;;  %v1056_v23 = vsel %vm370_vm10, %v4906_v21, 0.0 }
 0x5e5   :  { %1057 = vadd.xlane.f32.xlu0 %v1056_v23  ;;  %v1059_v27 = vsel %vm370_vm10, %v5329_v22, 0.0  ;;  %v4910_v28 = vpop.eup %4909  ;;  %v1462_v44 = vpop.permute.xlu1 %1461 }
 0x5e6   :  { %1060 = vadd.xlane.f32.xlu1 %v1059_v27  ;;  %v1053_v40 = vsel %vm370_vm10, %v4910_v28, 0.0 }
 0x5e7   :  { %v4912_v30 = vpop.eup %4911 }
 0x5e8   :  { %v1062_v37 = vsel %vm370_vm10, %v4912_v30, 0.0 }
 0x5e9   :  { %1063 = vadd.xlane.f32.xlu0 %v1062_v37 }
 0x5ea   :  { %1054 = vadd.xlane.f32.xlu1 %v1053_v40 }
 0x5fb   :  { %1613 = vrot.lane.b32.xlu1 %v5231_v39, %s5022_s1 }
 0x5ff   :  { %1537 = vrot.lane.b32.xlu0 %v5215_v35, %s5022_s1 }
 0x611   :  { %v1046_v45 = vpop.xlane.xlu0 %1045 }
 0x612   :  { %4913 = vrcp.f32 %v1046_v45 }
 0x615   :  { %v1043_v46 = vpop.xlane.xlu1 %1042 }
 0x616   :  { %4915 = vrcp.f32 %v1043_v46 }
 0x61c   :  { %v4914_v47 = vpop.eup %4913 }
 0x61d   :  { %v1068_v48 = vmul.f32 %v4914_v47, %v5317_v34 }
 0x61f   :  { %4484 = vmatmul.mubr.msk.f32.vlgmr.msra.gmra.mrb[16].mxu1 %vm370_vm10, %v1068_v48 }
 0x620   :  { %v4916_v49 = vpop.eup %4915  ;;  %4492 = vmatpush3.msra.mxu1 %v1310_v42  ;;  %4493 = vmatprep.mubr.msk.f32.mxu1 %vm5016_vm9, %v5015_v31 }
 0x621   :  { %v1066_v35 = vmul.f32 %v4916_v49, %v5321_v29  ;;  %4501 = vmatprep.subr.mxu1 %v5015_v31 }
 0x623   :  { %4479 = vmatmul.mubr.msk.f32.vlgmr.msra.gmra.mrb[4].mxu0 %vm370_vm10, %v1066_v35  ;;  %v1724_v35 = vrot.slane %v5179_v26, %v5164_v15 }
 0x624   :  { %4487 = vmatpush3.msra.mxu0 %v1234_v41  ;;  %4488 = vmatprep.mubr.msk.f32.mxu0 %vm5016_vm9, %v5015_v31 }
 0x625   :  { %4496 = vmatprep.subr.mxu0 %v5015_v31 }
 0x666   :  { %v1049_v39 = vpop.xlane.xlu1 %1048 }
 0x667   :  { %4917 = vrcp.f32 %v1049_v39 }
 0x66b   :  { %v1052_v50 = vpop.xlane.xlu0 %1051 }
 0x66c   :  { %4919 = vrcp.f32 %v1052_v50 }
 0x671   :  { %v4918_v51 = vpop.eup %4917 }
 0x672   :  { %v1070_v52 = vmul.f32 %v4918_v51, %v4902_v6  ;;  %v1058_v53 = vpop.xlane.xlu0 %1057  ;;  %v261_v6 = vld [vmem:[%s5812_s5] sm:$0xff] }
 0x673   :  { %4921 = vrcp.f32 %v1058_v53  ;;  %v1061_v54 = vpop.xlane.xlu1 %1060  ;;  %v4747_v9 = vpack.c.bf16 %v262_v7, %v261_v6 }
 0x674   :  { %4489 = vmatmul.mubr.msk.f32.vlgmr.msra.gmra.mrb[6].mxu0 %vm370_vm10, %v1070_v52 }
 0x675   :  { %4497 = vmatpush3.msra.mxu0 %v1386_v43  ;;  %4498 = vmatprep.mubr.msk.f32.mxu0 %vm5016_vm9, %v5015_v31 }
 0x676   :  { %v4920_v55 = vpop.eup %4919  ;;  %v1064_v32 = vpop.xlane.xlu0 %1063  ;;  %4506 = vmatprep.subr.mxu0 %v5015_v31 }
 0x677   :  { %v1072_v56 = vmul.f32 %v4920_v55, %v4904_v18  ;;  %4923 = vrcp.f32 %v1064_v32  ;;  %v1055_v34 = vpop.xlane.xlu1 %1054 }
 0x678   :  { %4925 = vrcp.f32 %v1055_v34 }
 0x679   :  { %4494 = vmatmul.mubr.msk.f32.vlgmr.msra.gmra.mrb[18].mxu1 %vm370_vm10, %v1072_v56  ;;  %4927 = vrcp.f32 %v1061_v54  ;;  %v4853_v56 = vpack.i.bf16 %v262_v7, %v261_v6 }
 0x67a   :  { %4502 = vmatpush3.msra.mxu1 %v1462_v44  ;;  %4503 = vmatprep.mubr.msk.f32.mxu1 %vm5016_vm9, %v5015_v31  ;;  %v1538_v62 = vpop.permute.xlu0 %1537 }
 0x67b   :  { %4511 = vmatprep.subr.mxu1 %v5015_v31  ;;  %v1614_v38 = vpop.permute.xlu1 %1613 }
 0x67d   :  { %v4922_v33 = vpop.eup %4921 }
 0x67e   :  { %v1076_v29 = vmul.f32 %v4922_v33, %v4906_v21 }
 0x680   :  { %4504 = vmatmul.mubr.msk.f32.vlgmr.msra.gmra.mrb[20].mxu1 %vm370_vm10, %v1076_v29 }
 0x681   :  { %v4924_v36 = vpop.eup %4923  ;;  %4512 = vmatpush3.msra.mxu1 %v1614_v38  ;;  %4513 = vmatprep.mubr.msk.f32.mxu1 %vm5016_vm9, %v5015_v31 }
 0x682   :  { %v4926_v58 = vpop.eup %4925  ;;  %v1080_v59 = vmul.f32 %v4924_v36, %v4912_v30 }
 0x683   :  { %v1074_v60 = vmul.f32 %v4926_v58, %v4910_v28  ;;  %v4928_v61 = vpop.eup %4927 }
 0x684   :  { %4514 = vmatmul.mubr.msk.f32.vlgmr.msra.gmra.mrb[22].mxu1 %vm370_vm10, %v1080_v59  ;;  %v1078_v63 = vmul.f32 %v4928_v61, %v5329_v22  ;;  %v4858_v61 = vpack.i.bf16 %v264_v10, %v5377_v14  ;;  %v5408_v10 = vsub.s32 2, %v5155_v12 }
 0x685   :  { %4499 = vmatmul.mubr.msk.f32.vlgmr.msra.gmra.mrb[8].mxu0 %vm370_vm10, %v1074_v60 }
 0x686   :  { %4507 = vmatpush3.msra.mxu0 %v1538_v62  ;;  %4508 = vmatprep.mubr.msk.f32.mxu0 %vm5016_vm9, %v5015_v31 }
 0x687   :  { %4748 = vmatprep.subr.bf16.mxu0 %v4747_v9 }
 0x689   :  { %4509 = vmatmul.mubr.msk.f32.vlgmr.msra.gmra.mrb[10].mxu0 %vm370_vm10, %v1078_v63 }
 0x68a   :  { %4750 = vmatpush3.bf16.msra.mxu0 %v4747_v9 }
 0x68b   :  { %4752 = vmatprep.subr.bf16.mxu0 %v4751_v17 }
 0x68e   :  { %4754 = vmatpush3.bf16.msra.mxu0 %v4751_v17 }
 0x6f2   :  { %v1229_v0 = vpop.f32.mrb[16].mxu1 }
 0x6f3   :  { %v4485_v2 = vpop.f32.mrb[17].mxu1 }
 0x6f6   :  { %v1153_v3 = vpop.f32.mrb[4].mxu0 }
 0x6f7   :  { %v4480_v4 = vpop.f32.mrb[5].mxu0 }
 0x747   :  { %v1305_v5 = vpop.f32.mrb[6].mxu0 }
 0x748   :  { %1691 = vrot.lane.b32.xlu0 %v1305_v5, %s5023_s0  ;;  %v4490_v8 = vpop.f32.mrb[7].mxu0 }
 0x74c   :  { %v1381_v11 = vpop.f32.mrb[18].mxu1 }
 0x74d   :  { %1693 = vrot.lane.b32.xlu1 %v1381_v11, %s5023_s0  ;;  %v4495_v16 = vpop.f32.mrb[19].mxu1 }
 0x753   :  { %v1533_v18 = vpop.f32.mrb[20].mxu1 }
 0x754   :  { %1701 = vrot.lane.b32.xlu1 %v1533_v18, %s5024_s23  ;;  %v4505_v19 = vpop.f32.mrb[21].mxu1 }
 0x755   :  { %v1837_v19 = vrot.slane %v5179_v26, %v5408_v10 }
 0x757   :  { %v1685_v20 = vpop.f32.mrb[22].mxu1 }
 0x758   :  { %v1457_v21 = vpop.f32.mrb[8].mxu0  ;;  %1709 = vrot.lane.b32.xlu1 %v1685_v20, %s5025_s24  ;;  %v4515_v22 = vpop.f32.mrb[23].mxu1  ;;  %v5413_v20 = vsub.s32 3, %v5155_v12 }
 0x759   :  { %1699 = vrot.lane.b32.xlu0 %v1457_v21, %s5024_s23  ;;  %v4500_v23 = vpop.f32.mrb[9].mxu0 }
 0x75c   :  { %v1609_v27 = vpop.f32.mrb[10].mxu0 }
 0x75d   :  { %1707 = vrot.lane.b32.xlu0 %v1609_v27, %s5025_s24  ;;  %v4510_v28 = vpop.f32.mrb[11].mxu0  ;;  %v1843_v27 = vrot.slane %v5179_v26, %v5413_v20 }
 0x7ba   :  { %v1692_v37 = vpop.permute.xlu0 %1691 }
 0x7bb   :  { %v1713_v42 = vsel %vm370_vm10, %v1153_v3, %v1692_v37 }
 0x7bf   :  { %v1694_v30 = vpop.permute.xlu1 %1693 }
 0x7c0   :  { %v1714_v44 = vsel %vm370_vm10, %v1229_v0, %v1694_v30 }
 0x7c6   :  { %v1702_v40 = vpop.permute.xlu1 %1701 }
 0x7c7   :  { %v1717_v47 = vsel %vm1715_vm11, %v1714_v44, %v1702_v40  ;;  %v1965_v40 = vld [vmem:[%s5813_s6] sm:$0xff]  ;;  %v1968_v44 = vld [vmem:[%s5813_s6 + $0x18] sm:$0xff] }
 0x7ca   :  { %v1710_v43 = vpop.permute.xlu1 %1709 }
 0x7cb   :  { %v1700_v41 = vpop.permute.xlu0 %1699  ;;  %v1720_v49 = vsel %vm1718_vm12, %v1717_v47, %v1710_v43  ;;  %v1967_v43 = vld [vmem:[%s5813_s6 + $0x10] sm:$0xff]  ;;  %v1970_v47 = vld [vmem:[%s5813_s6 + $0x28] sm:$0xff] }
 0x7cc   :  { %v1716_v45 = vsel %vm1715_vm11, %v1713_v42, %v1700_v41  ;;  %v1966_v41 = vld [vmem:[%s5813_s6 + $0x8] sm:$0xff] }
 0x7cd   :  { %v4763_v42 = vpack.c.bf16 %v1966_v41, %v1965_v40 }
 0x7cf   :  { %v1708_v46 = vpop.permute.xlu0 %1707  ;;  %4764 = vmatprep.subr.bf16.mxu0 %v4763_v42 }
 0x7d0   :  { %v1719_v48 = vsel %vm1718_vm12, %v1716_v45, %v1708_v46  ;;  %v4767_v45 = vpack.c.bf16 %v1968_v44, %v1967_v43  ;;  %v1969_v46 = vld [vmem:[%s5813_s6 + $0x20] sm:$0xff]  ;;  %v4201_v44 = vld [vmem:[%s5811_s4 + $0x30] sm:$0xff] }
 0x7d1   :  { %4524 = vmatprep.mubr.msk.f32.mxu0 %vm183_vm8, %v1719_v48  ;;  %v4771_v48 = vpack.c.bf16 %v1970_v47, %v1969_v46 }
 0x7d2   :  { %4525 = vmatmul.mubr.msk.f32.vlgmr.msra.gmra.mrb[12].mxu0 %vm183_vm8, %v1720_v49  ;;  %v1971_v49 = vld [vmem:[%s5813_s6 + $0x30] sm:$0xff] }
 0x7d3   :  { %4766 = vmatpush3.bf16.msra.mxu0 %v4763_v42  ;;  %v4200_v42 = vld [vmem:[%s5811_s4 + $0x28] sm:$0xff] }
 0x7d4   :  { %4768 = vmatprep.subr.bf16.mxu0 %v4767_v45 }
 0x7d7   :  { %4770 = vmatpush3.bf16.msra.mxu0 %v4767_v45  ;;  %v4202_v45 = vld [vmem:[%s5811_s4 + $0x38] sm:$0xff] }
 0x7d8   :  { %4772 = vmatprep.subr.bf16.mxu0 %v4771_v48  ;;  %v4783_v46 = vpack.c.bf16 %v4202_v45, %v4201_v44 }
 0x7db   :  { %4774 = vmatpush3.bf16.msra.mxu0 %v4771_v48 }
 0x8a5   :  { %v4526_v39 = vpop.f32.mrb[12].mxu0 }
 0x8a6   :  { %v1803_v50 = vadd.f32 %v4526_v39, %v1724_v35  ;;  %v1797_v51 = vpop.f32.mrb[13].mxu0 }
 0x8a7   :  { %v1798_v52 = vadd.f32 %v1797_v51, %v1724_v35  ;;  %v1972_v35 = vld [vmem:[%s5813_s6 + $0x38] sm:$0xff] }
 0x8a8   :  { %v1807_v53 = vadd.f32 %v1803_v50, %v5170_v25  ;;  %v4775_v39 = vpack.c.bf16 %v1972_v35, %v1971_v49  ;;  %v1848_v50 = vsub.s32 4, %v5155_v12 }
 0x8a9   :  { %v1806_v54 = vadd.f32 %v1798_v52, %v5168_v24 }
 0x8aa   :  { %v1811_v55 = vsel %vm183_vm8, %v1807_v53, 0.0  ;;  %4776 = vmatprep.subr.bf16.mxu0 %v4775_v39  ;;  %v1849_v51 = vrot.slane %v5179_v26, %v1848_v50 }
 0x8ab   :  { %1812 = vadd.xlane.f32.xlu1 %v1811_v55  ;;  %v1808_v32 = vsel %vm183_vm8, %v1806_v54, 0.0  ;;  %4778 = vmatpush3.bf16.msra.mxu0 %v4775_v39 }
 0x8ac   :  { %1809 = vadd.xlane.f32.xlu0 %v1808_v32  ;;  %4578 = vmatprep.subr.mxu0 %v5015_v31 }
 0x8bc   :  { %4854 = vrot.lane.b32.xlu1 %v4853_v56, %s5020_s13 }
 0x938   :  { %v1813_v34 = vpop.xlane.xlu1 %1812 }
 0x939   :  { %v1815_v33 = vmul.f32 0.03125, %v1813_v34  ;;  %v1810_v29 = vpop.xlane.xlu0 %1809 }
 0x93a   :  { %v1814_v38 = vmul.f32 0.03125, %v1810_v29 }
 0x93b   :  { %v1817_v36 = vsub.f32 %v1807_v53, %v1815_v33 }
 0x93c   :  { %v1816_v58 = vsub.f32 %v1806_v54, %v1814_v38  ;;  %v4855_v62 = vpop.permute.xlu1 %4854 }
 0x93d   :  { %v1819_v59 = vmul.f32 %v1817_v36, %v1817_v36  ;;  %v4857_v63 = vunpack.i.h.bf16 %v4855_v62  ;;  %v4856_v0 = vunpack.i.l.bf16 %v4855_v62 }
 0x93e   :  { %v1818_v60 = vmul.f32 %v1816_v58, %v1816_v58 }
 0x93f   :  { %v1823_v25 = vsel %vm183_vm8, %v1819_v59, 0.0  ;;  %v4755_v2 = vpack.c.bf16 %v4857_v63, %v4856_v0 }
 0x940   :  { %1824 = vadd.xlane.f32.xlu0 %v1823_v25  ;;  %v1820_v24 = vsel %vm183_vm8, %v1818_v60, 0.0 }
 0x941   :  { %4756 = vmatprep.subr.bf16.mxu1 %v4755_v2 }
 0x942   :  { %4758 = vmatpush3.bf16.msra.mxu1 %v4755_v2 }
 0x944   :  { %1821 = vadd.xlane.f32.xlu0 %v1820_v24 }
 0x95a   :  { %4859 = vrot.lane.b32.xlu0 %v4858_v61, %s5020_s13 }
 0x9cd   :  { %v1825_v3 = vpop.xlane.xlu0 %1824 }
 0x9ce   :  { %v1827_v4 = vmul.f32 0.03125, %v1825_v3 }
 0x9d0   :  { %v1829_v5 = vadd.f32 1e-12, %v1827_v4  ;;  %v1975_v4 = vsub.s32 5, %v5155_v12 }
 0x9d1   :  { %v1822_v6 = vpop.xlane.xlu0 %1821 }
 0x9d2   :  { %4929 = vrsqrt.f32 %v1829_v5  ;;  %v1826_v7 = vmul.f32 0.03125, %v1822_v6  ;;  %v1976_v5 = vrot.slane %v5179_v26, %v1975_v4 }
 0x9d4   :  { %v1828_v8 = vadd.f32 1e-12, %v1826_v7 }
 0x9d5   :  { %v4860_v9 = vpop.permute.xlu0 %4859 }
 0x9d6   :  { %4931 = vrsqrt.f32 %v1828_v8  ;;  %v4862_v11 = vunpack.i.h.bf16 %v4860_v9  ;;  %v4861_v16 = vunpack.i.l.bf16 %v4860_v9 }
 0x9d8   :  { %v4759_v14 = vpack.c.bf16 %v4862_v11, %v4861_v16 }
 0x9da   :  { %4760 = vmatprep.subr.bf16.mxu1 %v4759_v14 }
 0x9db   :  { %4762 = vmatpush3.bf16.msra.mxu1 %v4759_v14 }
 0x9dc   :  { %v4930_v17 = vpop.eup %4929 }
 0x9dd   :  { %v1833_v18 = vmul.f32 %v4930_v17, %v1817_v36 }
 0x9df   :  { %v1839_v23 = vmul.f32 %v1837_v19, %v1833_v18 }
 0x9e0   :  { %v4932_v21 = vpop.eup %4931 }
 0x9e1   :  { %v1832_v22 = vmul.f32 %v4932_v21, %v1816_v58  ;;  %v1845_v37 = vadd.f32 %v1843_v27, %v1839_v23 }
 0x9e3   :  { %v1838_v28 = vmul.f32 %v1837_v19, %v1832_v22 }
 0x9e5   :  { %v1844_v30 = vadd.f32 %v1843_v27, %v1838_v28 }
 0x9e7   :  { %4535 = vmatprep.mubr.msk.f32.mxu1 %vm183_vm8, %v1844_v30 }
 0x9e8   :  { %4536 = vmatmul.mubr.msk.f32.vlgmr.msra.gmra.mrb[24].mxu1 %vm183_vm8, %v1845_v37 }
 0xabb   :  { %v4537_v52 = vpop.f32.mrb[24].mxu1 }
 0xabc   :  { %v1944_v53 = vadd.f32 %v4537_v52, %v1849_v51  ;;  %v1938_v54 = vpop.f32.mrb[25].mxu1  ;;  %v2089_v52 = vsub.s32 6, %v5155_v12 }
 0xabd   :  { %v1939_v55 = vadd.f32 %v1938_v54, %v1849_v51 }
 0xabe   :  { %v1950_v32 = vmul.f32 0.044715, %v1944_v53  ;;  %v1948_v0 = vmul.f32 0.5, %v1944_v53  ;;  %v2090_v54 = vrot.slane %v5179_v26, %v2089_v52 }
 0xabf   :  { %v1949_v56 = vmul.f32 0.044715, %v1939_v55  ;;  %v1947_v62 = vmul.f32 0.5, %v1939_v55 }
 0xac0   :  { %v1952_v34 = vmul.f32 %v1950_v32, %v1944_v53 }
 0xac1   :  { %v1951_v33 = vmul.f32 %v1949_v56, %v1939_v55 }
 0xac2   :  { %v1954_v29 = vmul.f32 %v1952_v34, %v1944_v53 }
 0xac3   :  { %v1953_v38 = vmul.f32 %v1951_v33, %v1939_v55 }
 0xac4   :  { %v1956_v36 = vadd.f32 %v1954_v29, %v1944_v53  ;;  %v2095_v53 = vsub.s32 7, %v5155_v12 }
 0xac5   :  { %v1955_v58 = vadd.f32 %v1953_v38, %v1939_v55 }
 0xac6   :  { %v1958_v59 = vmul.f32 0.7978846, %v1956_v36  ;;  %v2096_v33 = vrot.slane %v5179_v26, %v2095_v53 }
 0xac7   :  { %v1957_v25 = vmul.f32 0.7978846, %v1955_v58 }
 0xac8   :  { %4933 = vtanh.f32 %v1958_v59  ;;  %v5494_v59 = vld [vmem:[%s5814_s7 + $0x8] sm:$0xff] }
 0xac9   :  { %4935 = vtanh.f32 %v1957_v25  ;;  %v2114_v26 = vrot.slane %v5494_v59, %v5158_v13 }
 0xad2   :  { %v4934_v60 = vpop.eup %4933 }
 0xad3   :  { %v4936_v24 = vpop.eup %4935  ;;  %v1962_v61 = vadd.f32 1.0, %v4934_v60 }
 0xad4   :  { %v1961_v63 = vadd.f32 1.0, %v4936_v24 }
 0xad5   :  { %v1964_v3 = vmul.f32 %v1962_v61, %v1948_v0 }
 0xad6   :  { %v1963_v2 = vmul.f32 %v1961_v63, %v1947_v62 }
 0xad8   :  { %4554 = vmatprep.mubr.msk.f32.mxu0 %vm1977_vm13, %v1963_v2 }
 0xad9   :  { %4555 = vmatmul.mubr.msk.f32.vlgmr.msra.gmra.mrb[14].mxu0 %vm1977_vm13, %v1964_v3 }
 0xada   :  { %4580 = vmatprep.mubr.msk.f32.mxu0 %vm5016_vm9, %v5015_v31 }
 0xbac   :  { %v4556_v6 = vpop.f32.mrb[14].mxu0 }
 0xbad   :  { %v2056_v7 = vadd.f32 %v4556_v6, %v1976_v5  ;;  %v2050_v8 = vpop.f32.mrb[15].mxu0 }
 0xbae   :  { %v2051_v9 = vadd.f32 %v2050_v8, %v1976_v5 }
 0xbaf   :  { %v2060_v11 = vadd.f32 %v2056_v7, %v1845_v37 }
 0xbb0   :  { %v2059_v16 = vadd.f32 %v2051_v9, %v1844_v30  ;;  %v4199_v30 = vld [vmem:[%s5811_s4 + $0x20] sm:$0xff] }
 0xbb1   :  { %v2064_v14 = vsel %vm183_vm8, %v2060_v11, 0.0  ;;  %v4779_v43 = vpack.c.bf16 %v4200_v42, %v4199_v30 }
 0xbb2   :  { %2065 = vadd.xlane.f32.xlu0 %v2064_v14  ;;  %v2061_v17 = vsel %vm183_vm8, %v2059_v16, 0.0 }
 0xbb3   :  { %2062 = vadd.xlane.f32.xlu1 %v2061_v17  ;;  %4780 = vmatprep.subr.bf16.mxu1 %v4779_v43 }
 0xbb4   :  { %4782 = vmatpush3.bf16.msra.mxu1 %v4779_v43 }
 0xbb5   :  { %4784 = vmatprep.subr.bf16.mxu1 %v4783_v46 }
 0xbb8   :  { %4786 = vmatpush3.bf16.msra.mxu1 %v4783_v46 }
 0xbb9   :  { %4568 = vmatprep.subr.mxu1 %v5015_v31 }
 0xc3f   :  { %v2066_v18 = vpop.xlane.xlu0 %2065 }
 0xc40   :  { %v2068_v19 = vmul.f32 0.03125, %v2066_v18  ;;  %v2063_v21 = vpop.xlane.xlu1 %2062 }
 0xc41   :  { %v2067_v22 = vmul.f32 0.03125, %v2063_v21 }
 0xc42   :  { %v2070_v23 = vsub.f32 %v2060_v11, %v2068_v19 }
 0xc43   :  { %v2069_v27 = vsub.f32 %v2059_v16, %v2067_v22 }
 0xc44   :  { %v2072_v28 = vmul.f32 %v2070_v23, %v2070_v23 }
 0xc45   :  { %v2071_v40 = vmul.f32 %v2069_v27, %v2069_v27 }
 0xc46   :  { %v2076_v41 = vsel %vm183_vm8, %v2072_v28, 0.0 }
 0xc47   :  { %2077 = vadd.xlane.f32.xlu0 %v2076_v41  ;;  %v2073_v37 = vsel %vm183_vm8, %v2071_v40, 0.0 }
 0xc48   :  { %2074 = vadd.xlane.f32.xlu1 %v2073_v37 }
 0xcd4   :  { %v2078_v47 = vpop.xlane.xlu0 %2077 }
 0xcd5   :  { %v2080_v48 = vmul.f32 0.03125, %v2078_v47  ;;  %v2075_v49 = vpop.xlane.xlu1 %2074 }
 0xcd6   :  { %v2079_v35 = vmul.f32 0.03125, %v2075_v49 }
 0xcd7   :  { %v2082_v39 = vadd.f32 1e-12, %v2080_v48 }
 0xcd8   :  { %v2081_v51 = vadd.f32 1e-12, %v2079_v35 }
 0xcd9   :  { %4937 = vrsqrt.f32 %v2082_v39 }
 0xcda   :  { %4939 = vrsqrt.f32 %v2081_v51 }
 0xce3   :  { %v4938_v55 = vpop.eup %4937 }
 0xce4   :  { %v4940_v32 = vpop.eup %4939  ;;  %v2086_v56 = vmul.f32 %v4938_v55, %v2070_v23 }
 0xce5   :  { %v2085_v34 = vmul.f32 %v4940_v32, %v2069_v27 }
 0xce6   :  { %v2092_v29 = vmul.f32 %v2090_v54, %v2086_v56 }
 0xce7   :  { %v2091_v38 = vmul.f32 %v2090_v54, %v2085_v34 }
 0xce8   :  { %v5483_v58 = vadd.f32 %v2096_v33, %v2092_v29 }
 0xce9   :  { %v5481_v36 = vadd.f32 %v2096_v33, %v2091_v38 }
 0xceb   :  { %4565 = vmatprep.mubr.msk.f32.mxu1 %vm183_vm8, %v5481_v36 }
 0xcec   :  { %4566 = vmatmul.mubr.msk.f32.vlgmr.msra.gmra.mrb[26].mxu1 %vm183_vm8, %v5483_v58 }
 0xced   :  { %4570 = vmatprep.mubr.msk.f32.mxu1 %vm5016_vm9, %v5015_v31 }
 0xdbf   :  { %v4567_v25 = vpop.f32.mrb[26].mxu1 }
 0xdc0   :  { %v5498_v60 = vadd.f32 %v4567_v25, %v2114_v26  ;;  %v2187_v24 = vpop.f32.mrb[27].mxu1 }
 0xdc1   :  { %v5500_v61 = vadd.f32 %v2187_v24, %v2114_v26 }
 0xdc2   :  { %2200 = vrot.lane.b32.xlu0 %v5498_v60, %s5017_s10 }
 0xdc3   :  { %2198 = vrot.lane.b32.xlu1 %v5500_v61, %s5017_s10 }
 0xdc6   :  { %2206 = vrot.lane.b32.xlu0 %v5500_v61, %s5018_s11 }
 0xdc7   :  { %2202 = vrot.lane.b32.xlu1 %v5500_v61, %s5019_s12 }
 0xdca   :  { %2210 = vrot.lane.b32.xlu0 %v5500_v61, %s5020_s13 }
 0xdcb   :  { %2204 = vrot.lane.b32.xlu1 %v5498_v60, %s5019_s12 }
 0xdcf   :  { %2208 = vrot.lane.b32.xlu1 %v5498_v60, %s5018_s11 }
 0xdd3   :  { %2286 = vrot.lane.b32.xlu1 %v5498_v60, %s5020_s13 }
 0xe34   :  { %v5518_v13 = vpop.permute.xlu0 %2200 }
 0xe35   :  { %2438 = vrot.lane.b32.xlu1 %v5518_v13, %s5020_s13  ;;  %v5522_v62 = vpop.permute.xlu1 %2198 }
 0xe36   :  { %2362 = vrot.lane.b32.xlu0 %v5522_v62, %s5020_s13 }
 0xe38   :  { %v5526_v63 = vpop.permute.xlu0 %2206 }
 0xe39   :  { %v5528_v0 = vpop.permute.xlu1 %2202 }
 0xe3a   :  { %2514 = vrot.lane.b32.xlu0 %v5528_v0, %s5020_s13 }
 0xe3c   :  { %v2211_v2 = vpop.permute.xlu0 %2210 }
 0xe3d   :  { %4569 = vmatpush3.xpose.msk.msra.mxu1 %vm370_vm10, %v2211_v2  ;;  %v5533_v3 = vpop.permute.xlu1 %2204 }
 0xe3e   :  { %2666 = vrot.lane.b32.xlu0 %v5526_v63, %s5020_s13  ;;  %2590 = vrot.lane.b32.xlu1 %v5533_v3, %s5020_s13 }
 0xe3f   :  { %4573 = vmatprep.subr.mxu1 %v5015_v31 }
 0xe40   :  { %4571 = vmatmul.mubr.msk.f32.vlgmr.msra.gmra.mrb[28].mxu1 %vm370_vm10, %v5500_v61 }
 0xe41   :  { %v5542_v5 = vpop.permute.xlu1 %2208  ;;  %4575 = vmatprep.mubr.msk.f32.mxu1 %vm5016_vm9, %v5015_v31 }
 0xe42   :  { %2742 = vrot.lane.b32.xlu1 %v5542_v5, %s5020_s13 }
 0xe45   :  { %v2287_v6 = vpop.permute.xlu1 %2286 }
 0xe46   :  { %4574 = vmatpush3.xpose.msk.msra.mxu1 %vm370_vm10, %v2287_v6 }
 0xe47   :  { %4583 = vmatprep.subr.mxu1 %v5015_v31 }
 0xe49   :  { %4576 = vmatmul.mubr.msk.f32.vlgmr.msra.gmra.mrb[30].mxu1 %vm370_vm10, %v5498_v60 }
 0xe4a   :  { %4585 = vmatprep.mubr.msk.f32.mxu1 %vm5016_vm9, %v5015_v31 }
 0xea7   :  { %v2439_v7 = vpop.permute.xlu1 %2438 }
 0xea8   :  { %v2363_v8 = vpop.permute.xlu0 %2362  ;;  %4584 = vmatpush3.xpose.msk.msra.mxu1 %vm370_vm10, %v2439_v7 }
 0xea9   :  { %4579 = vmatpush3.xpose.msk.msra.mxu0 %vm370_vm10, %v2363_v8  ;;  %4593 = vmatprep.subr.mxu1 %v5015_v31 }
 0xeaa   :  { %4588 = vmatprep.subr.mxu0 %v5015_v31 }
 0xeab   :  { %4586 = vmatmul.mubr.msk.f32.vlgmr.msra.gmra.mrb[32].mxu1 %vm370_vm10, %v5518_v13 }
 0xeac   :  { %4581 = vmatmul.mubr.msk.f32.vlgmr.msra.gmra.mrb[16].mxu0 %vm370_vm10, %v5522_v62  ;;  %v2515_v9 = vpop.permute.xlu0 %2514  ;;  %4595 = vmatprep.mubr.msk.f32.mxu1 %vm5016_vm9, %v5015_v31 }
 0xead   :  { %4589 = vmatpush3.xpose.msk.msra.mxu0 %vm370_vm10, %v2515_v9  ;;  %4590 = vmatprep.mubr.msk.f32.mxu0 %vm5016_vm9, %v5015_v31 }
 0xeae   :  { %4598 = vmatprep.subr.mxu0 %v5015_v31 }
 0xeb0   :  { %4591 = vmatmul.mubr.msk.f32.vlgmr.msra.gmra.mrb[18].mxu0 %vm370_vm10, %v5528_v0  ;;  %v2667_v11 = vpop.permute.xlu0 %2666  ;;  %v2591_v16 = vpop.permute.xlu1 %2590 }
 0xeb1   :  { %4594 = vmatpush3.xpose.msk.msra.mxu1 %vm370_vm10, %v2591_v16  ;;  %4599 = vmatpush3.xpose.msk.msra.mxu0 %vm370_vm10, %v2667_v11 }
 0xeb2   :  { %4600 = vmatprep.mubr.msk.f32.mxu0 %vm5016_vm9, %v5015_v31  ;;  %4603 = vmatprep.subr.mxu1 %v5015_v31 }
 0xeb3   :  { %4608 = vmatprep.subr.mxu0 %v5015_v31 }
 0xeb4   :  { %4596 = vmatmul.mubr.msk.f32.vlgmr.msra.gmra.mrb[34].mxu1 %vm370_vm10, %v5533_v3  ;;  %4601 = vmatmul.mubr.msk.f32.vlgmr.msra.gmra.mrb[20].mxu0 %vm370_vm10, %v5526_v63  ;;  %v2743_v14 = vpop.permute.xlu1 %2742 }
 0xeb5   :  { %4604 = vmatpush3.xpose.msk.msra.mxu1 %vm370_vm10, %v2743_v14  ;;  %4605 = vmatprep.mubr.msk.f32.mxu1 %vm5016_vm9, %v5015_v31 }
 0xeb6   :  { %4613 = vmatprep.subr.mxu1 %v5015_v31  ;;  %4610 = vmatprep.mubr.msk.f32.mxu0 %vm5016_vm9, %v5015_v31 }
 0xeb8   :  { %4606 = vmatmul.mubr.msk.f32.vlgmr.msra.gmra.mrb[36].mxu1 %vm370_vm10, %v5542_v5 }
 0xeb9   :  { %4615 = vmatprep.mubr.msk.f32.mxu1 %vm5016_vm9, %v5015_v31 }
 0xf13   :  { %v2282_v17 = vpop.f32.mrb[28].mxu1 }
 0xf14   :  { %v2818_v18 = vmul.f32 0.35355338, %v2282_v17  ;;  %v4572_v19 = vpop.f32.mrb[29].mxu1 }
 0xf16   :  { %v2826_v21 = vadd.f32 %v2818_v18, %v5284_v57 }
 0xf18   :  { %v2834_v22 = vsel %vm370_vm10, %v2826_v21, -inf }
 0xf19   :  { %2835 = vmax.xlane.f32.xlu0 %v2834_v22 }
 0xf1c   :  { %v2358_v23 = vpop.f32.mrb[30].mxu1 }
 0xf1d   :  { %v2819_v27 = vmul.f32 0.35355338, %v2358_v23  ;;  %v4577_v28 = vpop.f32.mrb[31].mxu1 }
 0xf1f   :  { %v2827_v40 = vadd.f32 %v2819_v27, %v5289_v1 }
 0xf21   :  { %v2837_v41 = vsel %vm370_vm10, %v2827_v40, -inf }
 0xf22   :  { %2838 = vmax.xlane.f32.xlu1 %v2837_v41 }
 0xf7e   :  { %v2510_v37 = vpop.f32.mrb[32].mxu1 }
 0xf7f   :  { %v2821_v30 = vmul.f32 0.35355338, %v2510_v37  ;;  %v2434_v42 = vpop.f32.mrb[16].mxu0  ;;  %v4587_v43 = vpop.f32.mrb[33].mxu1 }
 0xf80   :  { %v2820_v44 = vmul.f32 0.35355338, %v2434_v42  ;;  %v4582_v45 = vpop.f32.mrb[17].mxu0 }
 0xf81   :  { %v2829_v48 = vadd.f32 %v2821_v30, %v5289_v1 }
 0xf82   :  { %v2828_v46 = vadd.f32 %v2820_v44, %v5284_v57 }
 0xf83   :  { %v2586_v47 = vpop.f32.mrb[18].mxu0  ;;  %v2843_v32 = vsel %vm370_vm10, %v2829_v48, -inf }
 0xf84   :  { %v2822_v49 = vmul.f32 0.35355338, %v2586_v47  ;;  %v4592_v35 = vpop.f32.mrb[19].mxu0  ;;  %v2840_v39 = vsel %vm370_vm10, %v2828_v46, -inf }
 0xf85   :  { %2841 = vmax.xlane.f32.xlu0 %v2840_v39 }
 0xf86   :  { %v2830_v51 = vadd.f32 %v2822_v49, %v5284_v57 }
 0xf87   :  { %v2662_v54 = vpop.f32.mrb[34].mxu1  ;;  %v2738_v55 = vpop.f32.mrb[20].mxu0 }
 0xf88   :  { %v2823_v56 = vmul.f32 0.35355338, %v2662_v54  ;;  %v2824_v34 = vmul.f32 0.35355338, %v2738_v55  ;;  %v4597_v33 = vpop.f32.mrb[35].mxu1  ;;  %v4602_v29 = vpop.f32.mrb[21].mxu0 }
 0xf89   :  { %v2846_v38 = vsel %vm370_vm10, %v2830_v51, -inf  ;;  %2844 = vmax.xlane.f32.xlu0 %v2843_v32 }
 0xf8a   :  { %2847 = vmax.xlane.f32.xlu1 %v2846_v38  ;;  %v2832_v26 = vadd.f32 %v2824_v34, %v5284_v57  ;;  %v2831_v25 = vadd.f32 %v2823_v56, %v5289_v1 }
 0xf8b   :  { %v2814_v24 = vpop.f32.mrb[36].mxu1 }
 0xf8c   :  { %v2825_v2 = vmul.f32 0.35355338, %v2814_v24  ;;  %v4607_v6 = vpop.f32.mrb[37].mxu1  ;;  %v2852_v7 = vsel %vm370_vm10, %v2832_v26, -inf  ;;  %v2849_v8 = vsel %vm370_vm10, %v2831_v25, -inf }
 0xf8d   :  { %2850 = vmax.xlane.f32.xlu0 %v2849_v8 }
 0xf8e   :  { %2853 = vmax.xlane.f32.xlu1 %v2852_v7  ;;  %v2833_v9 = vadd.f32 %v2825_v2, %v5289_v1 }
 0xf90   :  { %v2855_v11 = vsel %vm370_vm10, %v2833_v9, -inf }
 0xf91   :  { %2856 = vmax.xlane.f32.xlu0 %v2855_v11 }
 0xf9f   :  { %2922 = vrot.lane.b32.xlu1 %v5500_v61, %s5022_s1 }
 0xfa3   :  { %3074 = vrot.lane.b32.xlu1 %v5522_v62, %s5022_s1 }
 0xfa6   :  { %v2836_v16 = vpop.xlane.xlu0 %2835 }
 0xfa7   :  { %3150 = vrot.lane.b32.xlu1 %v5518_v13, %s5022_s1  ;;  %2998 = vrot.lane.b32.xlu0 %v5498_v60, %s5022_s1  ;;  %v2858_v61 = vsub.f32 %v2826_v21, %v2836_v16 }
 0xfa9   :  { %v2866_v17 = vmul.f32 1.442695, %v2858_v61 }
 0xfab   :  { %3302 = vrot.lane.b32.xlu1 %v5533_v3, %s5022_s1  ;;  %3226 = vrot.lane.b32.xlu0 %v5528_v0, %s5022_s1 }
 0xfaf   :  { %v2839_v57 = vpop.xlane.xlu1 %2838 }
 0xfb0   :  { %v2859_v1 = vsub.f32 %v2827_v40, %v2839_v57 }
 0xfb2   :  { %v2868_v14 = vmul.f32 1.442695, %v2859_v1 }
 0xfb4   :  { %4941 = vpow2.f32 %v2868_v14 }
 0xfb5   :  { %4943 = vpow2.f32 %v2866_v17 }
 0xfbe   :  { %v5618_v62 = vpop.eup %4941 }
 0xfbf   :  { %v2885_v13 = vsel %vm370_vm10, %v5618_v62, 0.0  ;;  %v5622_v60 = vpop.eup %4943 }
 0xfc0   :  { %v2882_v3 = vsel %vm370_vm10, %v5622_v60, 0.0 }
 0xfca   :  { %2886 = vadd.xlane.f32.xlu0 %v2885_v13 }
 0xfcf   :  { %2883 = vadd.xlane.f32.xlu1 %v2882_v3 }
0x1012   :  { %v2842_v0 = vpop.xlane.xlu0 %2841 }
0x1013   :  { %v2860_v18 = vsub.f32 %v2828_v46, %v2842_v0 }
0x1015   :  { %v2870_v19 = vmul.f32 1.442695, %v2860_v18 }
0x1016   :  { %v2845_v22 = vpop.xlane.xlu0 %2844 }
0x1017   :  { %4945 = vpow2.f32 %v2870_v19  ;;  %v2861_v21 = vsub.f32 %v2829_v48, %v2845_v22  ;;  %v2848_v23 = vpop.xlane.xlu1 %2847 }
0x1018   :  { %v2862_v27 = vsub.f32 %v2830_v51, %v2848_v23 }
0x1019   :  { %v2872_v28 = vmul.f32 1.442695, %v2861_v21 }
0x101a   :  { %v2874_v40 = vmul.f32 1.442695, %v2862_v27  ;;  %v2851_v41 = vpop.xlane.xlu0 %2850 }
0x101b   :  { %4947 = vpow2.f32 %v2872_v28  ;;  %v2863_v37 = vsub.f32 %v2831_v25, %v2851_v41  ;;  %v2854_v30 = vpop.xlane.xlu1 %2853 }
0x101c   :  { %4949 = vpow2.f32 %v2874_v40  ;;  %v2864_v42 = vsub.f32 %v2832_v26, %v2854_v30 }
0x101d   :  { %v2876_v43 = vmul.f32 1.442695, %v2863_v37 }
0x101e   :  { %v2878_v44 = vmul.f32 1.442695, %v2864_v42  ;;  %v2857_v45 = vpop.xlane.xlu0 %2856 }
0x101f   :  { %4951 = vpow2.f32 %v2876_v43  ;;  %v2865_v47 = vsub.f32 %v2833_v9, %v2857_v45  ;;  %v2923_v46 = vpop.permute.xlu1 %2922  ;;  %v4196_v45 = vld [vmem:[%s5812_s5 + $0x28] sm:$0xff] }
0x1020   :  { %4953 = vpow2.f32 %v2878_v44  ;;  %4609 = vmatpush3.msra.mxu0 %v2923_v46  ;;  %v4195_v44 = vld [vmem:[%s5812_s5 + $0x20] sm:$0xff] }
0x1021   :  { %v4946_v49 = vpop.eup %4945  ;;  %v2880_v48 = vmul.f32 1.442695, %v2865_v47  ;;  %4618 = vmatprep.subr.mxu0 %v5015_v31  ;;  %v4863_v47 = vpack.i.bf16 %v4196_v45, %v4195_v44  ;;  %v4787_v46 = vpack.c.bf16 %v4196_v45, %v4195_v44 }
0x1022   :  { %v2999_v35 = vpop.permute.xlu0 %2998  ;;  %v2888_v39 = vsel %vm370_vm10, %v4946_v49, 0.0 }
0x1023   :  { %4955 = vpow2.f32 %v2880_v48  ;;  %2889 = vadd.xlane.f32.xlu1 %v2888_v39  ;;  %4614 = vmatpush3.msra.mxu1 %v2999_v35  ;;  %v3075_v25 = vpop.permute.xlu1 %3074  ;;  %v4198_v48 = vld [vmem:[%s5812_s5 + $0x38] sm:$0xff] }
0x1024   :  { %4623 = vmatprep.subr.mxu1 %v5015_v31 }
0x1025   :  { %v4948_v51 = vpop.eup %4947 }
0x1026   :  { %v4950_v54 = vpop.eup %4949  ;;  %v2891_v55 = vsel %vm370_vm10, %v4948_v51, 0.0  ;;  %v3227_v2 = vpop.permute.xlu0 %3226 }
0x1027   :  { %2892 = vadd.xlane.f32.xlu0 %v2891_v55  ;;  %v2894_v32 = vsel %vm370_vm10, %v4950_v54, 0.0  ;;  %v3151_v24 = vpop.permute.xlu1 %3150 }
0x1028   :  { %2895 = vadd.xlane.f32.xlu1 %v2894_v32 }
0x1029   :  { %v4952_v56 = vpop.eup %4951 }
0x102a   :  { %v4954_v34 = vpop.eup %4953  ;;  %v2897_v33 = vsel %vm370_vm10, %v4952_v56, 0.0 }
0x102b   :  { %2898 = vadd.xlane.f32.xlu0 %v2897_v33  ;;  %v2900_v29 = vsel %vm370_vm10, %v4954_v34, 0.0  ;;  %v3303_v7 = vpop.permute.xlu1 %3302 }
0x102c   :  { %2901 = vadd.xlane.f32.xlu1 %v2900_v29 }
0x102d   :  { %v5633_v38 = vpop.eup %4955 }
0x102e   :  { %v2903_v26 = vsel %vm370_vm10, %v5633_v38, 0.0 }
0x102f   :  { %2904 = vadd.xlane.f32.xlu0 %v2903_v26 }
0x103d   :  { %3454 = vrot.lane.b32.xlu1 %v5542_v5, %s5022_s1 }
0x1045   :  { %3378 = vrot.lane.b32.xlu0 %v5526_v63, %s5022_s1 }
0x1057   :  { %v2887_v6 = vpop.xlane.xlu0 %2886 }
0x1058   :  { %4957 = vrcp.f32 %v2887_v6 }
0x105c   :  { %v2884_v8 = vpop.xlane.xlu1 %2883 }
0x105d   :  { %4959 = vrcp.f32 %v2884_v8 }
0x1062   :  { %v4958_v9 = vpop.eup %4957 }
0x1063   :  { %v2909_v11 = vmul.f32 %v4958_v9, %v5618_v62 }
0x1065   :  { %4616 = vmatmul.mubr.msk.f32.vlgmr.msra.gmra.mrb[38].mxu1 %vm370_vm10, %v2909_v11 }
0x1066   :  { %4624 = vmatpush3.msra.mxu1 %v3151_v24  ;;  %4625 = vmatprep.mubr.msk.f32.mxu1 %vm5016_vm9, %v5015_v31 }
0x1067   :  { %v4960_v5 = vpop.eup %4959  ;;  %4633 = vmatprep.subr.mxu1 %v5015_v31 }
0x1068   :  { %v2907_v63 = vmul.f32 %v4960_v5, %v5622_v60 }
0x106a   :  { %4611 = vmatmul.mubr.msk.f32.vlgmr.msra.gmra.mrb[22].mxu0 %vm370_vm10, %v2907_v63 }
0x106b   :  { %4619 = vmatpush3.msra.mxu0 %v3075_v25  ;;  %4620 = vmatprep.mubr.msk.f32.mxu0 %vm5016_vm9, %v5015_v31 }
0x106c   :  { %4628 = vmatprep.subr.mxu0 %v5015_v31 }
0x10b0   :  { %v2890_v57 = vpop.xlane.xlu1 %2889 }
0x10b1   :  { %4961 = vrcp.f32 %v2890_v57 }
0x10b4   :  { %v2893_v1 = vpop.xlane.xlu0 %2892 }
0x10b5   :  { %4963 = vrcp.f32 %v2893_v1  ;;  %v2896_v16 = vpop.xlane.xlu1 %2895 }
0x10b6   :  { %4965 = vrcp.f32 %v2896_v16 }
0x10b8   :  { %v2899_v14 = vpop.xlane.xlu0 %2898 }
0x10b9   :  { %4967 = vrcp.f32 %v2899_v14  ;;  %v2902_v61 = vpop.xlane.xlu1 %2901 }
0x10ba   :  { %4969 = vrcp.f32 %v2902_v61  ;;  %v3563_v61 = vrot.slane %v5494_v59, %v5164_v15 }
0x10bb   :  { %v4962_v17 = vpop.eup %4961 }
0x10bc   :  { %v2911_v62 = vmul.f32 %v4962_v17, %v4946_v49  ;;  %v2905_v13 = vpop.xlane.xlu0 %2904  ;;  %v4197_v49 = vld [vmem:[%s5812_s5 + $0x30] sm:$0xff] }
0x10bd   :  { %4971 = vrcp.f32 %v2905_v13  ;;  %v3455_v28 = vpop.permute.xlu1 %3454  ;;  %v4868_v35 = vpack.i.bf16 %v4198_v48, %v4197_v49  ;;  %v4791_v39 = vpack.c.bf16 %v4198_v48, %v4197_v49 }
0x10be   :  { %4621 = vmatmul.mubr.msk.f32.vlgmr.msra.gmra.mrb[24].mxu0 %vm370_vm10, %v2911_v62 }
0x10bf   :  { %v4964_v60 = vpop.eup %4963  ;;  %4629 = vmatpush3.msra.mxu0 %v3227_v2  ;;  %4630 = vmatprep.mubr.msk.f32.mxu0 %vm5016_vm9, %v5015_v31 }
0x10c0   :  { %v4966_v3 = vpop.eup %4965  ;;  %v2913_v0 = vmul.f32 %v4964_v60, %v4948_v51  ;;  %4638 = vmatprep.subr.mxu0 %v5015_v31  ;;  %v3379_v19 = vpop.permute.xlu0 %3378 }
0x10c1   :  { %v2915_v18 = vmul.f32 %v4966_v3, %v4950_v54 }
0x10c2   :  { %4626 = vmatmul.mubr.msk.f32.vlgmr.msra.gmra.mrb[40].mxu1 %vm370_vm10, %v2913_v0 }
0x10c3   :  { %v4968_v22 = vpop.eup %4967  ;;  %4631 = vmatmul.mubr.msk.f32.vlgmr.msra.gmra.mrb[26].mxu0 %vm370_vm10, %v2915_v18  ;;  %4634 = vmatpush3.msra.mxu1 %v3303_v7 }
0x10c4   :  { %v4970_v21 = vpop.eup %4969  ;;  %v2917_v23 = vmul.f32 %v4968_v22, %v4952_v56  ;;  %4639 = vmatpush3.msra.mxu0 %v3379_v19  ;;  %4635 = vmatprep.mubr.msk.f32.mxu1 %vm5016_vm9, %v5015_v31 }
0x10c5   :  { %v2919_v27 = vmul.f32 %v4970_v21, %v4954_v34  ;;  %4640 = vmatprep.mubr.msk.f32.mxu0 %vm5016_vm9, %v5015_v31  ;;  %4643 = vmatprep.subr.mxu1 %v5015_v31 }
0x10c6   :  { %4636 = vmatmul.mubr.msk.f32.vlgmr.msra.gmra.mrb[42].mxu1 %vm370_vm10, %v2917_v23  ;;  %4788 = vmatprep.subr.bf16.mxu0 %v4787_v46 }
0x10c7   :  { %v4972_v40 = vpop.eup %4971  ;;  %4641 = vmatmul.mubr.msk.f32.vlgmr.msra.gmra.mrb[28].mxu0 %vm370_vm10, %v2919_v27  ;;  %4644 = vmatpush3.msra.mxu1 %v3455_v28 }
0x10c8   :  { %v2921_v41 = vmul.f32 %v4972_v40, %v5633_v38  ;;  %4645 = vmatprep.mubr.msk.f32.mxu1 %vm5016_vm9, %v5015_v31  ;;  %4790 = vmatpush3.bf16.msra.mxu0 %v4787_v46 }
0x10c9   :  { %4792 = vmatprep.subr.bf16.mxu0 %v4791_v39 }
0x10ca   :  { %4646 = vmatmul.mubr.msk.f32.vlgmr.msra.gmra.mrb[44].mxu1 %vm370_vm10, %v2921_v41 }
0x10cc   :  { %4794 = vmatpush3.bf16.msra.mxu0 %v4791_v39 }
0x1138   :  { %v3070_v37 = vpop.f32.mrb[38].mxu1 }
0x1139   :  { %v4617_v30 = vpop.f32.mrb[39].mxu1 }
0x113d   :  { %v2994_v42 = vpop.f32.mrb[22].mxu0 }
0x113e   :  { %v4612_v43 = vpop.f32.mrb[23].mxu0 }
0x1191   :  { %v3146_v51 = vpop.f32.mrb[24].mxu0 }
0x1192   :  { %3532 = vrot.lane.b32.xlu0 %v3146_v51, %s5023_s0  ;;  %v4622_v54 = vpop.f32.mrb[25].mxu0 }
0x1195   :  { %v3222_v55 = vpop.f32.mrb[40].mxu1 }
0x1196   :  { %v3298_v32 = vpop.f32.mrb[26].mxu0  ;;  %3534 = vrot.lane.b32.xlu1 %v3222_v55, %s5023_s0  ;;  %v4627_v56 = vpop.f32.mrb[41].mxu1 }
0x1197   :  { %3540 = vrot.lane.b32.xlu0 %v3298_v32, %s5024_s23  ;;  %v4632_v34 = vpop.f32.mrb[27].mxu0  ;;  %v3676_v56 = vrot.slane %v5494_v59, %v5408_v10 }
0x1199   :  { %v3374_v33 = vpop.f32.mrb[42].mxu1 }
0x119a   :  { %v3450_v29 = vpop.f32.mrb[28].mxu0  ;;  %3542 = vrot.lane.b32.xlu1 %v3374_v33, %s5024_s23  ;;  %v4637_v38 = vpop.f32.mrb[43].mxu1 }
0x119b   :  { %3548 = vrot.lane.b32.xlu0 %v3450_v29, %s5025_s24  ;;  %v4642_v26 = vpop.f32.mrb[29].mxu0  ;;  %v3682_v38 = vrot.slane %v5494_v59, %v5413_v20 }
0x119d   :  { %v3526_v25 = vpop.f32.mrb[44].mxu1 }
0x119e   :  { %3550 = vrot.lane.b32.xlu1 %v3526_v25, %s5025_s24  ;;  %v4647_v24 = vpop.f32.mrb[45].mxu1 }
0x1204   :  { %v3533_v2 = vpop.permute.xlu0 %3532 }
0x1205   :  { %v3554_v8 = vsel %vm370_vm10, %v2994_v42, %v3533_v2  ;;  %v4233_v2 = vld [vmem:[%s5813_s6 + $0x40] sm:$0xff] }
0x1208   :  { %v3535_v6 = vpop.permute.xlu1 %3534 }
0x1209   :  { %v3541_v7 = vpop.permute.xlu0 %3540  ;;  %v3555_v57 = vsel %vm370_vm10, %v3070_v37, %v3535_v6  ;;  %v4234_v6 = vld [vmem:[%s5813_s6 + $0x48] sm:$0xff] }
0x120a   :  { %v3556_v11 = vsel %vm1715_vm11, %v3554_v8, %v3541_v7  ;;  %v4235_v7 = vld [vmem:[%s5813_s6 + $0x50] sm:$0xff]  ;;  %v4803_v8 = vpack.c.bf16 %v4234_v6, %v4233_v2  ;;  %v5026_v2 = vmov 0.0|0.0  }
0x120c   :  { %v3543_v9 = vpop.permute.xlu1 %3542  ;;  %4804 = vmatprep.subr.bf16.mxu0 %v4803_v8 }
0x120d   :  { %v3549_v5 = vpop.permute.xlu0 %3548  ;;  %v3557_v1 = vsel %vm1715_vm11, %v3555_v57, %v3543_v9  ;;  %v4236_v9 = vld [vmem:[%s5813_s6 + $0x58] sm:$0xff] }
0x120e   :  { %v3558_v63 = vsel %vm1718_vm12, %v3556_v11, %v3549_v5  ;;  %v4807_v11 = vpack.c.bf16 %v4236_v9, %v4235_v7  ;;  %v4237_v5 = vld [vmem:[%s5813_s6 + $0x60] sm:$0xff]  ;;  %v3944_v7 = vld [vmem:[%s5815_s8 + $0x30] sm:$0xff]  ;;  %v3939_v9 = vld [vmem:[%s5815_s8 + $0x8] sm:$0xff] }
0x120f   :  { %4656 = vmatprep.mubr.msk.f32.mxu0 %vm183_vm8, %v3558_v63  ;;  %v4238_v63 = vld [vmem:[%s5813_s6 + $0x68] sm:$0xff] }
0x1210   :  { %v3551_v16 = vpop.permute.xlu1 %3550  ;;  %v4811_v57 = vpack.c.bf16 %v4238_v63, %v4237_v5  ;;  %v3941_v5 = vld [vmem:[%s5815_s8 + $0x18] sm:$0xff] }
0x1211   :  { %v3559_v14 = vsel %vm1718_vm12, %v3557_v1, %v3551_v16  ;;  %v4239_v1 = vld [vmem:[%s5813_s6 + $0x70] sm:$0xff]  ;;  %v4240_v16 = vld [vmem:[%s5813_s6 + $0x78] sm:$0xff] }
0x1212   :  { %4657 = vmatmul.mubr.msk.f32.vlgmr.msra.gmra.mrb[30].mxu0 %vm183_vm8, %v3559_v14  ;;  %v4815_v14 = vpack.c.bf16 %v4240_v16, %v4239_v1  ;;  %v3945_v16 = vld [vmem:[%s5815_s8 + $0x38] sm:$0xff] }
0x1213   :  { %4806 = vmatpush3.bf16.msra.mxu0 %v4803_v8 }
0x1214   :  { %4808 = vmatprep.subr.bf16.mxu0 %v4807_v11 }
0x1217   :  { %4810 = vmatpush3.bf16.msra.mxu0 %v4807_v11  ;;  %v3943_v11 = vld [vmem:[%s5815_s8 + $0x28] sm:$0xff] }
0x1218   :  { %4812 = vmatprep.subr.bf16.mxu0 %v4811_v57 }
0x121b   :  { %4814 = vmatpush3.bf16.msra.mxu0 %v4811_v57 }
0x121c   :  { %4816 = vmatprep.subr.bf16.mxu0 %v4815_v14 }
0x121f   :  { %4818 = vmatpush3.bf16.msra.mxu0 %v4815_v14  ;;  %v4888_v14 = vpack.i.bf16 %v3945_v16, %v3944_v7 }
0x12e5   :  { %v4658_v17 = vpop.f32.mrb[30].mxu0 }
0x12e6   :  { %v3642_v62 = vadd.f32 %v4658_v17, %v3563_v61  ;;  %v3636_v13 = vpop.f32.mrb[31].mxu0 }
0x12e7   :  { %v3637_v60 = vadd.f32 %v3636_v13, %v3563_v61  ;;  %v3688_v61 = vrot.slane %v5494_v59, %v1848_v50 }
0x12e8   :  { %v3646_v3 = vadd.f32 %v3642_v62, %v5483_v58 }
0x12e9   :  { %v3645_v0 = vadd.f32 %v3637_v60, %v5481_v36 }
0x12ea   :  { %v3650_v18 = vsel %vm183_vm8, %v3646_v3, 0.0 }
0x12eb   :  { %3651 = vadd.xlane.f32.xlu1 %v3650_v18  ;;  %v3647_v19 = vsel %vm183_vm8, %v3645_v0, 0.0 }
0x12ec   :  { %3648 = vadd.xlane.f32.xlu0 %v3647_v19 }
0x12fc   :  { %4864 = vrot.lane.b32.xlu1 %v4863_v47, %s5020_s13 }
0x1378   :  { %v3652_v22 = vpop.xlane.xlu1 %3651 }
0x1379   :  { %v3654_v21 = vmul.f32 0.03125, %v3652_v22  ;;  %v3649_v23 = vpop.xlane.xlu0 %3648 }
0x137a   :  { %v3653_v15 = vmul.f32 0.03125, %v3649_v23 }
0x137b   :  { %v3656_v27 = vsub.f32 %v3646_v3, %v3654_v21 }
0x137c   :  { %v3655_v28 = vsub.f32 %v3645_v0, %v3653_v15  ;;  %v4865_v37 = vpop.permute.xlu1 %4864 }
0x137d   :  { %v3658_v40 = vmul.f32 %v3656_v27, %v3656_v27  ;;  %v4867_v30 = vunpack.i.h.bf16 %v4865_v37  ;;  %v4866_v42 = vunpack.i.l.bf16 %v4865_v37 }
0x137e   :  { %v3657_v58 = vmul.f32 %v3655_v28, %v3655_v28 }
0x137f   :  { %v3662_v41 = vsel %vm183_vm8, %v3658_v40, 0.0  ;;  %v4795_v43 = vpack.c.bf16 %v4867_v30, %v4866_v42 }
0x1380   :  { %3663 = vadd.xlane.f32.xlu0 %v3662_v41  ;;  %v3659_v36 = vsel %vm183_vm8, %v3657_v58, 0.0 }
0x1381   :  { %4796 = vmatprep.subr.bf16.mxu1 %v4795_v43 }
0x1382   :  { %4798 = vmatpush3.bf16.msra.mxu1 %v4795_v43  ;;  %v3816_v43 = vrot.slane %v5494_v59, %v1975_v4 }
0x1384   :  { %3660 = vadd.xlane.f32.xlu0 %v3659_v36 }
0x139a   :  { %4869 = vrot.lane.b32.xlu0 %v4868_v35, %s5020_s13 }
0x140d   :  { %v3664_v44 = vpop.xlane.xlu0 %3663 }
0x140e   :  { %v3666_v45 = vmul.f32 0.03125, %v3664_v44 }
0x1410   :  { %v3668_v47 = vadd.f32 1e-12, %v3666_v45 }
0x1411   :  { %v3661_v46 = vpop.xlane.xlu0 %3660 }
0x1412   :  { %4973 = vrsqrt.f32 %v3668_v47  ;;  %v3665_v49 = vmul.f32 0.03125, %v3661_v46 }
0x1414   :  { %v3667_v48 = vadd.f32 1e-12, %v3665_v49 }
0x1415   :  { %v4870_v39 = vpop.permute.xlu0 %4869 }
0x1416   :  { %4975 = vrsqrt.f32 %v3667_v48  ;;  %v4872_v51 = vunpack.i.h.bf16 %v4870_v39  ;;  %v4871_v54 = vunpack.i.l.bf16 %v4870_v39 }
0x1418   :  { %v4799_v55 = vpack.c.bf16 %v4872_v51, %v4871_v54 }
0x141a   :  { %4800 = vmatprep.subr.bf16.mxu1 %v4799_v55 }
0x141b   :  { %4802 = vmatpush3.bf16.msra.mxu1 %v4799_v55 }
0x141c   :  { %v4974_v35 = vpop.eup %4973  ;;  %4819 = vmatprep.subr.bf16.mxu1 %v5026_v2 }
0x141d   :  { %v3672_v32 = vmul.f32 %v4974_v35, %v3656_v27 }
0x141f   :  { %v3678_v29 = vmul.f32 %v3676_v56, %v3672_v32 }
0x1420   :  { %v4976_v34 = vpop.eup %4975 }
0x1421   :  { %v3671_v33 = vmul.f32 %v4976_v34, %v3655_v28  ;;  %v3684_v24 = vadd.f32 %v3682_v38, %v3678_v29 }
0x1423   :  { %v3677_v26 = vmul.f32 %v3676_v56, %v3671_v33 }
0x1425   :  { %v3683_v25 = vadd.f32 %v3682_v38, %v3677_v26  ;;  %v3938_v26 = vld [vmem:[%s5815_s8] sm:$0xff] }
0x1426   :  { %v4873_v63 = vpack.i.bf16 %v3939_v9, %v3938_v26 }
0x1427   :  { %4667 = vmatprep.mubr.msk.f32.mxu1 %vm183_vm8, %v3683_v25 }
0x1428   :  { %4668 = vmatmul.mubr.msk.f32.vlgmr.msra.gmra.mrb[46].mxu1 %vm183_vm8, %v3684_v24 }
0x1429   :  { %4697 = vmatprep.mubr.msk.f32.mxu1 %vm5016_vm9, %v5015_v31 }
0x14fb   :  { %v4669_v17 = vpop.f32.mrb[46].mxu1 }
0x14fc   :  { %v3783_v62 = vadd.f32 %v4669_v17, %v3688_v61  ;;  %v3777_v13 = vpop.f32.mrb[47].mxu1 }
0x14fd   :  { %v3778_v60 = vadd.f32 %v3777_v13, %v3688_v61 }
0x14fe   :  { %v3789_v3 = vmul.f32 0.044715, %v3783_v62  ;;  %v3787_v37 = vmul.f32 0.5, %v3783_v62 }
0x14ff   :  { %v3788_v0 = vmul.f32 0.044715, %v3778_v60  ;;  %v3786_v50 = vmul.f32 0.5, %v3778_v60 }
0x1500   :  { %v3791_v18 = vmul.f32 %v3789_v3, %v3783_v62 }
0x1501   :  { %v3790_v19 = vmul.f32 %v3788_v0, %v3778_v60  ;;  %v3929_v0 = vrot.slane %v5494_v59, %v2089_v52 }
0x1502   :  { %v3793_v22 = vmul.f32 %v3791_v18, %v3783_v62 }
0x1503   :  { %v3792_v21 = vmul.f32 %v3790_v19, %v3778_v60 }
0x1504   :  { %v3795_v23 = vadd.f32 %v3793_v22, %v3783_v62 }
0x1505   :  { %v3794_v15 = vadd.f32 %v3792_v21, %v3778_v60 }
0x1506   :  { %v3797_v27 = vmul.f32 0.7978846, %v3795_v23 }
0x1507   :  { %v3796_v28 = vmul.f32 0.7978846, %v3794_v15 }
0x1508   :  { %4977 = vtanh.f32 %v3797_v27 }
0x1509   :  { %4979 = vtanh.f32 %v3796_v28 }
0x1512   :  { %v4978_v40 = vpop.eup %4977 }
0x1513   :  { %v4980_v41 = vpop.eup %4979  ;;  %v3801_v58 = vadd.f32 1.0, %v4978_v40 }
0x1514   :  { %v3800_v36 = vadd.f32 1.0, %v4980_v41  ;;  %v3935_v41 = vrot.slane %v5494_v59, %v2095_v53 }
0x1515   :  { %v3803_v42 = vmul.f32 %v3801_v58, %v3787_v37 }
0x1516   :  { %v3802_v30 = vmul.f32 %v3800_v36, %v3786_v50 }
0x1518   :  { %4686 = vmatprep.mubr.msk.f32.mxu0 %vm1977_vm13, %v3802_v30 }
0x1519   :  { %4687 = vmatmul.mubr.msk.f32.vlgmr.msra.gmra.mrb[32].mxu0 %vm1977_vm13, %v3803_v42 }
0x15ec   :  { %v4688_v44 = vpop.f32.mrb[32].mxu0 }
0x15ed   :  { %v3895_v45 = vadd.f32 %v4688_v44, %v3816_v43  ;;  %v3889_v47 = vpop.f32.mrb[33].mxu0 }
0x15ee   :  { %v3890_v46 = vadd.f32 %v3889_v47, %v3816_v43 }
0x15ef   :  { %v3899_v49 = vadd.f32 %v3895_v45, %v3684_v24  ;;  %v3942_v24 = vld [vmem:[%s5815_s8 + $0x20] sm:$0xff] }
0x15f0   :  { %v3898_v48 = vadd.f32 %v3890_v46, %v3683_v25  ;;  %v3940_v25 = vld [vmem:[%s5815_s8 + $0x10] sm:$0xff]  ;;  %v4823_v8 = vpack.c.bf16 %v3944_v7, %v3942_v24  ;;  %v4883_v1 = vpack.i.bf16 %v3943_v11, %v3942_v24 }
0x15f1   :  { %v3903_v39 = vsel %vm183_vm8, %v3899_v49, 0.0  ;;  %v4820_v6 = vpack.c.bf16 %v3940_v25, %v3938_v26  ;;  %v4878_v57 = vpack.i.bf16 %v3941_v5, %v3940_v25 }
0x15f2   :  { %3904 = vadd.xlane.f32.xlu1 %v3903_v39  ;;  %v3900_v51 = vsel %vm183_vm8, %v3898_v48, 0.0 }
0x15f3   :  { %3901 = vadd.xlane.f32.xlu0 %v3900_v51  ;;  %4821 = vmatpush3.bf16.msra.mxu1 %v4820_v6 }
0x15f4   :  { %4822 = vmatprep.subr.bf16.mxu1 %v5026_v2 }
0x15f7   :  { %4824 = vmatpush3.bf16.msra.mxu1 %v4823_v8 }
0x15f8   :  { %4825 = vmatprep.subr.bf16.mxu1 %v5026_v2 }
0x167f   :  { %v3905_v54 = vpop.xlane.xlu1 %3904 }
0x1680   :  { %v3907_v55 = vmul.f32 0.03125, %v3905_v54  ;;  %v3902_v35 = vpop.xlane.xlu0 %3901  ;;  %v4987_v54 = vld [vmem:[%s5810_s3] sm:$0xff] }
0x1681   :  { %v3906_v32 = vmul.f32 0.03125, %v3902_v35 }
0x1682   :  { %v3909_v56 = vsub.f32 %v3899_v49, %v3907_v55  ;;  %v3949_v55 = vrot.slane %v4987_v54, %v5408_v10 }
0x1683   :  { %v3908_v34 = vsub.f32 %v3898_v48, %v3906_v32 }
0x1684   :  { %v3911_v33 = vmul.f32 %v3909_v56, %v3909_v56 }
0x1685   :  { %v3910_v4 = vmul.f32 %v3908_v34, %v3908_v34 }
0x1686   :  { %v3915_v29 = vsel %vm183_vm8, %v3911_v33, 0.0 }
0x1687   :  { %3916 = vadd.xlane.f32.xlu1 %v3915_v29  ;;  %v3912_v38 = vsel %vm183_vm8, %v3910_v4, 0.0 }
0x1688   :  { %3913 = vadd.xlane.f32.xlu0 %v3912_v38 }
0x1698   :  { %4874 = vrot.lane.b32.xlu1 %v4873_v63, %s5020_s13 }
0x169c   :  { %4884 = vrot.lane.b32.xlu1 %v4883_v1, %s5020_s13 }
0x169e   :  { %4879 = vrot.lane.b32.xlu0 %v4878_v57, %s5020_s13 }
0x16a0   :  { %4889 = vrot.lane.b32.xlu1 %v4888_v14, %s5020_s13 }
0x1714   :  { %v3917_v61 = vpop.xlane.xlu1 %3916 }
0x1715   :  { %v3919_v17 = vmul.f32 0.03125, %v3917_v61  ;;  %v3914_v62 = vpop.xlane.xlu0 %3913 }
0x1716   :  { %v3918_v13 = vmul.f32 0.03125, %v3914_v62 }
0x1717   :  { %v3921_v60 = vadd.f32 1e-12, %v3919_v17 }
0x1718   :  { %v3920_v3 = vadd.f32 1e-12, %v3918_v13  ;;  %v4875_v18 = vpop.permute.xlu1 %4874 }
0x1719   :  { %4981 = vrsqrt.f32 %v3921_v60  ;;  %v4880_v19 = vpop.permute.xlu0 %4879  ;;  %v4877_v21 = vunpack.i.h.bf16 %v4875_v18  ;;  %v4876_v23 = vunpack.i.l.bf16 %v4875_v18 }
0x171a   :  { %4983 = vrsqrt.f32 %v3920_v3  ;;  %v4882_v15 = vunpack.i.h.bf16 %v4880_v19  ;;  %v4881_v27 = vunpack.i.l.bf16 %v4880_v19 }
0x171b   :  { %v4057_v37 = vsel %vm4056_vm14, %v4876_v23, %v4877_v21 }
0x171c   :  { %v4058_v52 = vsel %vm4056_vm14, %v4881_v27, %v4882_v15  ;;  %v4885_v12 = vpop.permute.xlu1 %4884 }
0x171d   :  { %v4826_v44 = vpack.c.bf16 %v4058_v52, %v4057_v37  ;;  %v4887_v53 = vunpack.i.h.bf16 %v4885_v12  ;;  %v4886_v59 = vunpack.i.l.bf16 %v4885_v12 }
0x171f   :  { %v4059_v46 = vsel %vm4056_vm14, %v4886_v59, %v4887_v53 }
0x1720   :  { %v4890_v47 = vpop.permute.xlu1 %4889 }
0x1721   :  { %v4892_v49 = vunpack.i.h.bf16 %v4890_v47  ;;  %v4891_v48 = vunpack.i.l.bf16 %v4890_v47 }
0x1723   :  { %v4982_v22 = vpop.eup %4981  ;;  %v4060_v39 = vsel %vm4056_vm14, %v4891_v48, %v4892_v49 }
0x1724   :  { %v4984_v28 = vpop.eup %4983  ;;  %v3925_v40 = vmul.f32 %v4982_v22, %v3909_v56  ;;  %v4829_v51 = vpack.c.bf16 %v4060_v39, %v4059_v46 }
0x1725   :  { %v3924_v58 = vmul.f32 %v4984_v28, %v3908_v34  ;;  %v4031_v34 = vrot.slane %v4987_v54, %v5413_v20 }
0x1726   :  { %v3931_v50 = vmul.f32 %v3929_v0, %v3925_v40 }
0x1727   :  { %v3930_v36 = vmul.f32 %v3929_v0, %v3924_v58 }
0x1728   :  { %v3937_v30 = vadd.f32 %v3935_v41, %v3931_v50 }
0x1729   :  { %v3936_v42 = vadd.f32 %v3935_v41, %v3930_v36 }
0x172a   :  { %v3952_v43 = vrot.slane %v3937_v30, 7 }
0x172c   :  { %v3954_v45 = vsel %vm3953_vm15, %v3952_v43, %v3936_v42 }
0x172d   :  { %4698 = vmatmul.mubr.msk.f32.vlgmr.msra.gmra.mrb[48].mxu1 %vm183_vm8, %v3954_v45 }
0x172e   :  { %4827 = vmatpush3.bf16.msra.mxu1 %v4826_v44  ;;  %4708 = vmatprep.mubr.msk.f32.mxu1 %vm5016_vm9, %v5015_v31 }
0x172f   :  { %4828 = vmatprep.subr.bf16.mxu1 %v5026_v2 }
0x1732   :  { %4830 = vmatpush3.bf16.msra.mxu1 %v4829_v51 }
0x1800   :  { %v4023_v31 = vpop.f32.mrb[48].mxu1 }
0x1801   :  { %v4024_v35 = vadd.f32 %v4023_v31, %v3949_v55  ;;  %v4699_v32 = vpop.f32.mrb[49].mxu1 }
0x1803   :  { %4985 = vtanh.f32 %v4024_v35 }
0x180d   :  { %v4986_v56 = vpop.eup %4985 }
0x180e   :  { %4709 = vmatmul.mubr.msk.f32.vlgmr.msra.gmra.mrb[50].mxu1 %vm183_vm8, %v4986_v56 }
0x18e1   :  { %v4134_v33 = vpop.f32.mrb[50].mxu1 }
0x18e2   :  { %v4135_v4 = vadd.f32 %v4134_v33, %v4031_v34  ;;  %v4710_v29 = vpop.f32.mrb[51].mxu1 }
0x18e4   :  { %4138 = vst [vmem:[#allocation2] sm:$0x3] %v4135_v4 }
0x18e5   :  { %4999 = shalt.err (!%p4996_p4)
}
0x18e6   :  { %s5000_s26 = scalar_lea.hbm %s5816_s9, 32 }
0x18e7   :  { %p5001_p5 = scmp.ne.s32.totalorder %s5816_s9, %s5000_s26  ;;  %p5004_p6 = scmp.lt.u32.totalorder %s5000_s26, %s5816_s9 }
0x18e9   :  { %p5006_p7 = pnand %p5004_p6, %p5001_p5 }
0x18eb   :  { %5009 = shalt.err (!%p5006_p7)
}
0x18ec   :  { %4148 = dma.vmem_to_hbm [thread:$0]  %s4146_s21, 32, %s5816_s9, [#allocation3]  }
0x18ed   :  { %5010 = dma.done.wait [#allocation3], 32  }
0x18ee   :  { %5011 = vsyncadd [#allocation3], 4294967264 }
0x18ef   :  { %4152 = vsyncpa [#allocation3], 1 }

</bundles_post_ra>
